<compile_context>
chip_gen: v6e
topology: v6e:2x2x1
jax: 0.10.0
libtpu: 0.0.40
codegen_flags: <defaults>
</compile_context>

<pallas_src>
import functools

import jax
import jax.numpy as jnp
from jax.experimental import pallas as pl
from jax.experimental.pallas import tpu as pltpu


# ----------------------------------------------------------------------------
# The single fused kernel: encoder -> decoder -> fc2 -> scores -> losses
# ----------------------------------------------------------------------------

def _net_kernel(x_ref, adj_ref, fc1w_ref, fc1b_ref,
                c1w_ref, c1b_ref, c2w_ref, c2b_ref,
                d1w_ref, d1b_ref, d2w_ref, d2b_ref,
                fc2w_ref, fc2b_ref, w_ref,
                fuse_ref, used_ref, comp_ref, obf_ref, *, g_total):
    f32 = jnp.float32

    def mm(a, b):
        return jnp.dot(a, b, preferred_element_type=f32)

    # Shared weights: load once, reuse across the static graph loop.
    c1w, c1b = c1w_ref[...], c1b_ref[...]
    c2w, c2b = c2w_ref[...], c2b_ref[...]
    d1w, d1b = d1w_ref[...], d1b_ref[...]
    d2w, d2b = d2w_ref[...], d2b_ref[...]
    fc2w, fc2b = fc2w_ref[...], fc2b_ref[...]
    d2b2 = jnp.concatenate([d2b, d2b], axis=1)            # (1, 2F), hoisted

    # ---------------- encoder ----------------
    pre_feat, conv1_f, enc_H, gvecs, adjs = [], [], [], [], []
    for i in range(g_total):
        a = adj_ref[i]                                     # (N, N)
        adjs.append(a)
        h0 = mm(x_ref[i], fc1w_ref[i]) + fc1b_ref[i]       # fc1[i]       (N, F)
        pre_feat.append(h0)
        # conv1: (A @ h0) @ W1  -- F < Hd, contract the cheap dim against N^2
        h1 = mm(mm(a, h0), c1w) + c1b                      # (N, Hd)
        conv1_f.append(h1)
        # conv2: A @ (h1 @ W2)
        h2 = mm(a, mm(h1, c2w)) + c2b                      # (N, Hd)
        enc_H.append(h2)
        # global_vec[i] = sigmoid(column mean over nodes)
        gvecs.append(jax.nn.sigmoid(
            jnp.sum(h2, axis=0, keepdims=True) * (1.0 / h2.shape[0])))

    # used_feat = elu(mean over graphs of encoder_H)
    hsum = enc_H[0]
    for i in range(1, g_total):
        hsum = hsum + enc_H[i]
    m = hsum * (1.0 / g_total)
    used_ref[...] = jnp.where(m > 0.0, m, jnp.exp(jnp.minimum(m, 0.0)) - 1.0)

    # ---------------- decoder + fc2 ----------------
    # leave-one-out mean reuses the hoisted hsum (no per-graph re-summation)
    inv_gm1 = 1.0 / float(max(g_total - 1, 1))   # guard only matters for G == 1
    h_final, decov1_f, each_fin = [], [], []
    for i in range(g_total):
        a, h = adjs[i], enc_H[i]
        d = (hsum - h) * inv_gm1

        # deconv1 on both streams: one shared adjacency matmul on concat slab
        hw = mm(h, d1w)
        dw = mm(d, d1w)
        ag = mm(a, jnp.concatenate([hw, dw], axis=1))      # (N, 2*Hd)
        hd = hw.shape[1]
        h1d = ag[:, :hd] + d1b
        d1d = ag[:, hd:] + d1b
        decov1_f.append(h1d)

        # deconv2 on both streams: A @ (h @ W2), contract to small F first
        hw2 = mm(h1d, d2w)
        dw2 = mm(d1d, d2w)
        ag2 = mm(a, jnp.concatenate([hw2, dw2], axis=1))   # (N, 2F)
        fd = hw2.shape[1]
        h_final.append(ag2[:, :fd] + d2b)                  # needed only for loss
        # fc2 directly on the concatenated slab (no weight split / extra slice)
        each_fin.append(mm(ag2 + d2b2, fc2w) + fc2b)       # (N, F)

    # fuse_feat = sigmoid(mean over graphs of each_fin_feat)
    fsum = each_fin[0]
    for i in range(1, g_total):
        fsum = fsum + each_fin[i]
    fuse_ref[...] = jax.nn.sigmoid(fsum * (1.0 / g_total))

    # ---------------- comparison scores ----------------
    dn = (((1,), (1,)), ((), ()))          # contract feature dims of both sides
    # v_i = weight[i] @ global_vec[i]^T, stored as row i of V
    v_rows = [jax.lax.dot_general(gvecs[i], w_ref[i], dn,
                                  preferred_element_type=f32)
              for i in range(g_total)]
    V = jnp.concatenate(v_rows, axis=0)                    # (G, Hd)
    # one batched MXU op for every (i, j) score
    Hall = jnp.concatenate(enc_H, axis=0)                  # (G*N, Hd)
    S_all = jax.nn.sigmoid(
        jax.lax.dot_general(Hall, V, dn, preferred_element_type=f32))  # (G*N, G)
    n = enc_H[0].shape[0]
    S = [S_all[j * n:(j + 1) * n, :] for j in range(g_total)]          # (N, G)
    denom = S[0]
    for j in range(1, g_total):
        denom = denom + S[j]
    inv = 1.0 / denom                                      # (N, G)
    # comp_re[:, i*G + j] = S[j][:, i] / denom[:, i]
    cols = []
    for i in range(g_total):
        for j in range(g_total):
            cols.append(S[j][:, i:i + 1] * inv[:, i:i + 1])
    comp = jnp.concatenate(cols, axis=1)                   # (N, G*G)
    pad_w = comp_ref.shape[1] - comp.shape[1]
    if pad_w > 0:                                          # lane-dense padded store
        comp = jnp.concatenate([comp, jnp.zeros((n, pad_w), f32)], axis=1)
    comp_ref[...] = comp

    # ---------------- loss terms ----------------
    def fro(x):                                            # Frobenius norm, (1, 1)
        s = jnp.sum(jnp.sum(x * x, axis=1, keepdims=True), axis=0, keepdims=True)
        return jnp.sqrt(s)

    obf1 = jnp.zeros((1, 1), f32)
    for i in range(g_total):
        obf1 = obf1 + 0.5 * (fro(pre_feat[i] - h_final[i])
                             + fro(conv1_f[i] - decov1_f[i]))

    # reference's i != j double loop counts every unordered pair twice
    obf0 = jnp.zeros((1, 1), f32)
    for i in range(g_total):
        for j in range(i + 1, g_total):
            obf0 = obf0 + 2.0 * fro(each_fin[i] - each_fin[j])

    lane = jax.lax.broadcasted_iota(jnp.int32, (1, obf_ref.shape[1]), 1)
    obf_ref[...] = (jnp.where(lane == 0, obf1, 0.0)
                    + jnp.where(lane == 1, obf0, 0.0))


# ----------------------------------------------------------------------------
# Wrapper: one pallas_call, everything VMEM-resident
# ----------------------------------------------------------------------------

def _nbytes(shape, itemsize=4):
    n = itemsize
    for d in shape:
        n *= int(d)
    return n


def net_forward(params, x_stack, adj_stack):
    G, N, F = x_stack.shape
    Hd = params["conv1_w"].shape[1]
    lanes = 128
    comp_w = max(lanes, ((G * G + lanes - 1) // lanes) * lanes)

    kernel = functools.partial(_net_kernel, g_total=G)
    vmem = pl.BlockSpec(memory_space=pltpu.MemorySpace.VMEM)

    inputs = (
        x_stack, adj_stack,
        params["fc1_w"], params["fc1_b"].reshape(G, 1, F),
        params["conv1_w"], params["conv1_b"].reshape(1, Hd),
        params["conv2_w"], params["conv2_b"].reshape(1, Hd),
        params["deconv1_w"], params["deconv1_b"].reshape(1, Hd),
        params["deconv2_w"], params["deconv2_b"].reshape(1, F),
        params["fc2_w"], params["fc2_b"].reshape(1, F),
        params["weight"],
    )
    out_shape = (
        jax.ShapeDtypeStruct((N, F), jnp.float32),       # fuse_feat
        jax.ShapeDtypeStruct((N, Hd), jnp.float32),      # used_feat
        jax.ShapeDtypeStruct((N, comp_w), jnp.float32),  # comp_re (lane-dense pad)
        jax.ShapeDtypeStruct((1, lanes), jnp.float32),   # [obf1, obf0, 0, ...]
    )

    # advisory cost estimate so XLA schedules this small custom call tightly
    mm2 = lambda m, k, n_: 2 * m * k * n_
    flops_per_graph = (
        mm2(N, F, F)                                    # fc1
        + mm2(N, N, F) + mm2(N, F, Hd)                  # conv1
        + mm2(N, Hd, Hd) + mm2(N, N, Hd)                # conv2
        + 2 * mm2(N, Hd, Hd) + mm2(N, N, 2 * Hd)        # deconv1 (both streams)
        + 2 * mm2(N, Hd, F) + mm2(N, N, 2 * F)          # deconv2 (both streams)
        + mm2(N, 2 * F, F)                              # fc2
        + mm2(1, Hd, Hd)                                # weight[i] @ global_vec
    )
    flops = G * flops_per_graph + mm2(G * N, Hd, G)
    transcendentals = G * Hd + N * Hd + N * F + G * N * G
    bytes_accessed = (sum(_nbytes(a.shape) for a in inputs)
                      + sum(_nbytes(s.shape) for s in out_shape))

    fuse_feat, used_feat, comp_pad, obf_vec = pl.pallas_call(
        kernel,
        out_shape=out_shape,
        in_specs=[vmem] * len(inputs),
        out_specs=tuple([vmem] * len(out_shape)),
        cost_estimate=pl.CostEstimate(flops=flops,
                                      transcendentals=transcendentals,
                                      bytes_accessed=bytes_accessed),
    )(*inputs)

    comp_re = comp_pad[:, :G * G]
    return fuse_feat, used_feat, comp_re, obf_vec[0, 0], obf_vec[0, 1]


# ----------------------------------------------------------------------------
# Plain-JAX glue: parameters, graph construction, and a reference forward
# ----------------------------------------------------------------------------

def glorot(key, shape):
    lim = (6.0 / (shape[-2] + shape[-1])) ** 0.5
    return jax.random.uniform(key, shape, jnp.float32, -lim, lim)


def init_params(key, num_graphs, num_features, hidden=128):
    ks = jax.random.split(key, 9)
    return {
        "fc1_w": glorot(ks[0], (num_graphs, num_features, num_features)),
        "fc1_b": jnp.zeros((num_graphs, num_features), jnp.float32),
        "conv1_w": glorot(ks[1], (num_features, hidden)),
        "conv1_b": jnp.zeros((hidden,), jnp.float32),
        "conv2_w": glorot(ks[2], (hidden, hidden)),
        "conv2_b": jnp.zeros((hidden,), jnp.float32),
        "deconv1_w": glorot(ks[3], (hidden, hidden)),
        "deconv1_b": jnp.zeros((hidden,), jnp.float32),
        "deconv2_w": glorot(ks[4], (hidden, num_features)),
        "deconv2_b": jnp.zeros((num_features,), jnp.float32),
        "fc2_w": glorot(ks[5], (2 * num_features, num_features)),
        "fc2_b": jnp.zeros((num_features,), jnp.float32),
        # fc3 exists in __init__ but is never used in forward()
        "fc3_w": glorot(ks[6], (num_features, 3)),
        "fc3_b": jnp.zeros((3,), jnp.float32),
        "weight": glorot(ks[7], (num_graphs, hidden, hidden)),
    }


def make_edge_index(key, n):
    ring_src = jnp.arange(n, dtype=jnp.int32)
    ring_dst = (ring_src + 1) % n
    extra = jax.random.randint(key, (2, n // 2), 0, n, dtype=jnp.int32)
    src = jnp.concatenate([ring_src, extra[0]])
    dst = jnp.concatenate([ring_dst, extra[1]])
    return jnp.stack([src, dst])  # (2, E)


def build_norm_adj(edge_index, n):
    # symmetric-normalised adjacency with self-loops (GCNConv normalisation)
    src, dst = edge_index[0], edge_index[1]
    a = jnp.zeros((n, n), jnp.float32)
    a = a.at[dst, src].set(1.0)
    a = a.at[src, dst].set(1.0)  # treat graph as undirected
    a = jnp.maximum(a, jnp.eye(n, dtype=jnp.float32))
    deg = jnp.sum(a, axis=1)
    d = jax.lax.rsqrt(deg)
    return a * d[:, None] * d[None, :]


def net_forward_ref(params, xs, adjs):
    """Plain-JAX mirror of the PyTorch forward (for correctness checking)."""
    G, N, _ = xs.shape
    pre_feat, conv1_f, enc_H = [], [], []
    for i in range(G):
        h = xs[i] @ params["fc1_w"][i] + params["fc1_b"][i]
        pre_feat.append(h)
        h = adjs[i] @ (h @ params["conv1_w"]) + params["conv1_b"]
        conv1_f.append(h)
        h = adjs[i] @ (h @ params["conv2_w"]) + params["conv2_b"]
        enc_H.append(h)
    global_vec = [jax.nn.sigmoid(jnp.sum(enc_H[i], axis=0) / N) for i in range(G)]
    sum_dec = sum(enc_H)
    decoder_h = [(sum_dec - enc_H[i]) / (G - 1) for i in range(G)]
    h_1_all = list(enc_H)
    decov1_f, each_fin = [], []
    for i in range(G):
        a = adjs[i]
        h_1_all[i] = a @ (h_1_all[i] @ params["deconv1_w"]) + params["deconv1_b"]
        decov1_f.append(h_1_all[i])
        h_1_all[i] = a @ (h_1_all[i] @ params["deconv2_w"]) + params["deconv2_b"]
        d = a @ (decoder_h[i] @ params["deconv1_w"]) + params["deconv1_b"]
        d = a @ (d @ params["deconv2_w"]) + params["deconv2_b"]
        fuse_h = jnp.concatenate([h_1_all[i], d], axis=1)
        each_fin.append(fuse_h @ params["fc2_w"] + params["fc2_b"])
    comp_label = []
    for i in range(G):
        cols = [jax.nn.sigmoid(enc_H[j] @ params["weight"][i]
                               @ global_vec[i][:, None]) for j in range(G)]
        li = jnp.concatenate(cols, axis=1)
        li = li / jnp.sum(li, axis=1, keepdims=True)
        comp_label.append(li)
    comp_re = jnp.concatenate(comp_label, axis=1)
    fuse_feat = jax.nn.sigmoid(sum(each_fin) / G)
    used_feat = jax.nn.elu(sum(enc_H) / G)
    obf0, obf1 = 0.0, 0.0
    for i in range(G):
        obf1 = obf1 + (jnp.linalg.norm(pre_feat[i] - h_1_all[i])
                       + jnp.linalg.norm(conv1_f[i] - decov1_f[i])) / 2.0
        for j in range(G):
            if i != j:
                obf0 = obf0 + jnp.linalg.norm(each_fin[i] - each_fin[j])
    return fuse_feat, used_feat, comp_re, obf1, obf0


if __name__ == "__main__":
    NUM_GRAPHS = 2   # number_graphs
    N_NODES = 16     # nodes per graph
    NUM_FEATURES = 16
    HIDDEN = 128     # fixed by the module (GCNConv(F, 128), etc.)

    key = jax.random.PRNGKey(0)
    k_param, k_x, k_e = jax.random.split(key, 3)

    params = init_params(k_param, NUM_GRAPHS, NUM_FEATURES, HIDDEN)
    xs = jnp.stack([
        jax.random.normal(jax.random.fold_in(k_x, i),
                          (N_NODES, NUM_FEATURES), jnp.float32)
        for i in range(NUM_GRAPHS)
    ])                                                       # (G, N, F)
    adjs = jnp.stack([
        build_norm_adj(make_edge_index(jax.random.fold_in(k_e, i), N_NODES), N_NODES)
        for i in range(NUM_GRAPHS)
    ])                                                       # (G, N, N)

    outs = jax.jit(net_forward)(params, xs, adjs)
    jax.block_until_ready(outs)

    fuse_feat, used_feat, comp_re, obf1, obf0 = outs
    assert fuse_feat.shape == (N_NODES, NUM_FEATURES)
    assert used_feat.shape == (N_NODES, HIDDEN)
    assert comp_re.shape == (N_NODES, NUM_GRAPHS * NUM_GRAPHS)
    assert obf1.shape == () and obf0.shape == ()

    # correctness vs. a plain-JAX mirror of the PyTorch forward
    ref_outs = net_forward_ref(params, xs, adjs)
    names = ["fuse_feat", "used_feat", "comp_re", "obf1", "obf0"]
    for name, got, want in zip(names, outs, ref_outs):
        ok = jnp.allclose(jnp.asarray(got), jnp.asarray(want), rtol=2e-2, atol=2e-2)
        assert bool(ok), f"mismatch in {name}"

    print("KERNEL_OK")
</pallas_src>

<mosaic_0001>
module attributes {stable_mosaic.version = 11 : i64} {
  func.func @_net_kernel(%arg0: memref<2x16x16xf32, #tpu.memory_space<vmem>>, %arg1: memref<2x16x16xf32, #tpu.memory_space<vmem>>, %arg2: memref<2x16x16xf32, #tpu.memory_space<vmem>>, %arg3: memref<2x1x16xf32, #tpu.memory_space<vmem>>, %arg4: memref<16x128xf32, #tpu.memory_space<vmem>>, %arg5: memref<1x128xf32, #tpu.memory_space<vmem>>, %arg6: memref<128x128xf32, #tpu.memory_space<vmem>>, %arg7: memref<1x128xf32, #tpu.memory_space<vmem>>, %arg8: memref<128x128xf32, #tpu.memory_space<vmem>>, %arg9: memref<1x128xf32, #tpu.memory_space<vmem>>, %arg10: memref<128x16xf32, #tpu.memory_space<vmem>>, %arg11: memref<1x16xf32, #tpu.memory_space<vmem>>, %arg12: memref<32x16xf32, #tpu.memory_space<vmem>>, %arg13: memref<1x16xf32, #tpu.memory_space<vmem>>, %arg14: memref<2x128x128xf32, #tpu.memory_space<vmem>>, %arg15: memref<16x16xf32, #tpu.memory_space<vmem>>, %arg16: memref<16x128xf32, #tpu.memory_space<vmem>>, %arg17: memref<16x128xf32, #tpu.memory_space<vmem>>, %arg18: memref<1x128xf32, #tpu.memory_space<vmem>>) attributes {dimension_semantics = [], scalar_prefetch = 0 : i64, scratch_operands = 0 : i64, tpu.core_type = #tpu.core_type<tc>} {
    %c0 = arith.constant 0 : index
    %c0_0 = arith.constant 0 : index
    %0 = vector.load %arg4[%c0, %c0_0] : memref<16x128xf32, #tpu.memory_space<vmem>>, vector<16x128xf32>
    %c0_1 = arith.constant 0 : index
    %c0_2 = arith.constant 0 : index
    %1 = vector.load %arg5[%c0_1, %c0_2] : memref<1x128xf32, #tpu.memory_space<vmem>>, vector<1x128xf32>
    %c0_3 = arith.constant 0 : index
    %c0_4 = arith.constant 0 : index
    %2 = vector.load %arg6[%c0_3, %c0_4] : memref<128x128xf32, #tpu.memory_space<vmem>>, vector<128x128xf32>
    %c0_5 = arith.constant 0 : index
    %c0_6 = arith.constant 0 : index
    %3 = vector.load %arg7[%c0_5, %c0_6] : memref<1x128xf32, #tpu.memory_space<vmem>>, vector<1x128xf32>
    %c0_7 = arith.constant 0 : index
    %c0_8 = arith.constant 0 : index
    %4 = vector.load %arg8[%c0_7, %c0_8] : memref<128x128xf32, #tpu.memory_space<vmem>>, vector<128x128xf32>
    %c0_9 = arith.constant 0 : index
    %c0_10 = arith.constant 0 : index
    %5 = vector.load %arg9[%c0_9, %c0_10] : memref<1x128xf32, #tpu.memory_space<vmem>>, vector<1x128xf32>
    %c0_11 = arith.constant 0 : index
    %c0_12 = arith.constant 0 : index
    %6 = vector.load %arg10[%c0_11, %c0_12] : memref<128x16xf32, #tpu.memory_space<vmem>>, vector<128x16xf32>
    %c0_13 = arith.constant 0 : index
    %c0_14 = arith.constant 0 : index
    %7 = vector.load %arg11[%c0_13, %c0_14] : memref<1x16xf32, #tpu.memory_space<vmem>>, vector<1x16xf32>
    %c0_15 = arith.constant 0 : index
    %c0_16 = arith.constant 0 : index
    %8 = vector.load %arg12[%c0_15, %c0_16] : memref<32x16xf32, #tpu.memory_space<vmem>>, vector<32x16xf32>
    %c0_17 = arith.constant 0 : index
    %c0_18 = arith.constant 0 : index
    %9 = vector.load %arg13[%c0_17, %c0_18] : memref<1x16xf32, #tpu.memory_space<vmem>>, vector<1x16xf32>
    %10 = tpu.concatenate %7, %7 in 1 : vector<1x16xf32>, vector<1x16xf32> -> vector<1x32xf32>
    %c0_19 = arith.constant 0 : index
    %c0_20 = arith.constant 0 : index
    %c0_21 = arith.constant 0 : index
    %11 = vector.load %arg1[%c0_19, %c0_20, %c0_21] : memref<2x16x16xf32, #tpu.memory_space<vmem>>, vector<1x16x16xf32>
    %12 = vector.shape_cast %11 : vector<1x16x16xf32> to vector<16x16xf32>
    %c0_22 = arith.constant 0 : index
    %c0_23 = arith.constant 0 : index
    %c0_24 = arith.constant 0 : index
    %13 = vector.load %arg0[%c0_22, %c0_23, %c0_24] : memref<2x16x16xf32, #tpu.memory_space<vmem>>, vector<1x16x16xf32>
    %14 = vector.shape_cast %13 : vector<1x16x16xf32> to vector<16x16xf32>
    %c0_25 = arith.constant 0 : index
    %c0_26 = arith.constant 0 : index
    %c0_27 = arith.constant 0 : index
    %15 = vector.load %arg2[%c0_25, %c0_26, %c0_27] : memref<2x16x16xf32, #tpu.memory_space<vmem>>, vector<1x16x16xf32>
    %16 = vector.shape_cast %15 : vector<1x16x16xf32> to vector<16x16xf32>
    %cst = arith.constant dense<0.000000e+00> : vector<16x16xf32>
    %17 = tpu.matmul %14, %16, %cst {dimension_numbers = #tpu.dot_dimension_numbers<[1], [0], [0], [1], [0, 0, 1, 1], [], []>} : vector<16x16xf32>, vector<16x16xf32>, vector<16x16xf32> -> vector<16x16xf32>
    %c0_28 = arith.constant 0 : index
    %c0_29 = arith.constant 0 : index
    %c0_30 = arith.constant 0 : index
    %18 = vector.load %arg3[%c0_28, %c0_29, %c0_30] : memref<2x1x16xf32, #tpu.memory_space<vmem>>, vector<1x1x16xf32>
    %19 = vector.shape_cast %18 : vector<1x1x16xf32> to vector<1x16xf32>
    %20 = vector.broadcast %19 : vector<1x16xf32> to vector<16x16xf32>
    %21 = arith.addf %17, %20 : vector<16x16xf32>
    %cst_31 = arith.constant dense<0.000000e+00> : vector<16x16xf32>
    %22 = tpu.matmul %12, %21, %cst_31 {dimension_numbers = #tpu.dot_dimension_numbers<[1], [0], [0], [1], [0, 0, 1, 1], [], []>} : vector<16x16xf32>, vector<16x16xf32>, vector<16x16xf32> -> vector<16x16xf32>
    %cst_32 = arith.constant dense<0.000000e+00> : vector<16x128xf32>
    %23 = tpu.matmul %22, %0, %cst_32 {dimension_numbers = #tpu.dot_dimension_numbers<[1], [0], [0], [1], [0, 0, 1, 1], [], []>} : vector<16x16xf32>, vector<16x128xf32>, vector<16x128xf32> -> vector<16x128xf32>
    %24 = vector.broadcast %1 : vector<1x128xf32> to vector<16x128xf32>
    %25 = arith.addf %23, %24 : vector<16x128xf32>
    %cst_33 = arith.constant dense<0.000000e+00> : vector<16x128xf32>
    %26 = tpu.matmul %25, %2, %cst_33 {dimension_numbers = #tpu.dot_dimension_numbers<[1], [0], [0], [1], [0, 0, 1, 1], [], []>} : vector<16x128xf32>, vector<128x128xf32>, vector<16x128xf32> -> vector<16x128xf32>
    %cst_34 = arith.constant dense<0.000000e+00> : vector<16x128xf32>
    %27 = tpu.matmul %12, %26, %cst_34 {dimension_numbers = #tpu.dot_dimension_numbers<[1], [0], [0], [1], [0, 0, 1, 1], [], []>} : vector<16x16xf32>, vector<16x128xf32>, vector<16x128xf32> -> vector<16x128xf32>
    %28 = vector.broadcast %3 : vector<1x128xf32> to vector<16x128xf32>
    %29 = arith.addf %27, %28 : vector<16x128xf32>
    %cst_35 = arith.constant dense<0.000000e+00> : vector<128xf32>
    %30 = vector.multi_reduction <add>, %29, %cst_35 [0] : vector<16x128xf32> to vector<128xf32>
    %31 = vector.shape_cast %30 : vector<128xf32> to vector<1x128xf32>
    %cst_36 = arith.constant 6.250000e-02 : f32
    %32 = vector.broadcast %cst_36 : f32 to vector<1x128xf32>
    %33 = arith.mulf %31, %32 : vector<1x128xf32>
    %34 = arith.negf %33 : vector<1x128xf32>
    %35 = math.exp %34 : vector<1x128xf32>
    %cst_37 = arith.constant 1.000000e+00 : f32
    %36 = vector.broadcast %cst_37 : f32 to vector<1x128xf32>
    %37 = arith.addf %36, %35 : vector<1x128xf32>
    %38 = arith.divf %36, %37 : vector<1x128xf32>
    %c1 = arith.constant 1 : index
    %c0_38 = arith.constant 0 : index
    %c0_39 = arith.constant 0 : index
    %39 = vector.load %arg1[%c1, %c0_38, %c0_39] : memref<2x16x16xf32, #tpu.memory_space<vmem>>, vector<1x16x16xf32>
    %40 = vector.shape_cast %39 : vector<1x16x16xf32> to vector<16x16xf32>
    %c1_40 = arith.constant 1 : index
    %c0_41 = arith.constant 0 : index
    %c0_42 = arith.constant 0 : index
    %41 = vector.load %arg0[%c1_40, %c0_41, %c0_42] : memref<2x16x16xf32, #tpu.memory_space<vmem>>, vector<1x16x16xf32>
    %42 = vector.shape_cast %41 : vector<1x16x16xf32> to vector<16x16xf32>
    %c1_43 = arith.constant 1 : index
    %c0_44 = arith.constant 0 : index
    %c0_45 = arith.constant 0 : index
    %43 = vector.load %arg2[%c1_43, %c0_44, %c0_45] : memref<2x16x16xf32, #tpu.memory_space<vmem>>, vector<1x16x16xf32>
    %44 = vector.shape_cast %43 : vector<1x16x16xf32> to vector<16x16xf32>
    %cst_46 = arith.constant dense<0.000000e+00> : vector<16x16xf32>
    %45 = tpu.matmul %42, %44, %cst_46 {dimension_numbers = #tpu.dot_dimension_numbers<[1], [0], [0], [1], [0, 0, 1, 1], [], []>} : vector<16x16xf32>, vector<16x16xf32>, vector<16x16xf32> -> vector<16x16xf32>
    %c1_47 = arith.constant 1 : index
    %c0_48 = arith.constant 0 : index
    %c0_49 = arith.constant 0 : index
    %46 = vector.load %arg3[%c1_47, %c0_48, %c0_49] : memref<2x1x16xf32, #tpu.memory_space<vmem>>, vector<1x1x16xf32>
    %47 = vector.shape_cast %46 : vector<1x1x16xf32> to vector<1x16xf32>
    %48 = vector.broadcast %47 : vector<1x16xf32> to vector<16x16xf32>
    %49 = arith.addf %45, %48 : vector<16x16xf32>
    %cst_50 = arith.constant dense<0.000000e+00> : vector<16x16xf32>
    %50 = tpu.matmul %40, %49, %cst_50 {dimension_numbers = #tpu.dot_dimension_numbers<[1], [0], [0], [1], [0, 0, 1, 1], [], []>} : vector<16x16xf32>, vector<16x16xf32>, vector<16x16xf32> -> vector<16x16xf32>
    %cst_51 = arith.constant dense<0.000000e+00> : vector<16x128xf32>
    %51 = tpu.matmul %50, %0, %cst_51 {dimension_numbers = #tpu.dot_dimension_numbers<[1], [0], [0], [1], [0, 0, 1, 1], [], []>} : vector<16x16xf32>, vector<16x128xf32>, vector<16x128xf32> -> vector<16x128xf32>
    %52 = vector.broadcast %1 : vector<1x128xf32> to vector<16x128xf32>
    %53 = arith.addf %51, %52 : vector<16x128xf32>
    %cst_52 = arith.constant dense<0.000000e+00> : vector<16x128xf32>
    %54 = tpu.matmul %53, %2, %cst_52 {dimension_numbers = #tpu.dot_dimension_numbers<[1], [0], [0], [1], [0, 0, 1, 1], [], []>} : vector<16x128xf32>, vector<128x128xf32>, vector<16x128xf32> -> vector<16x128xf32>
    %cst_53 = arith.constant dense<0.000000e+00> : vector<16x128xf32>
    %55 = tpu.matmul %40, %54, %cst_53 {dimension_numbers = #tpu.dot_dimension_numbers<[1], [0], [0], [1], [0, 0, 1, 1], [], []>} : vector<16x16xf32>, vector<16x128xf32>, vector<16x128xf32> -> vector<16x128xf32>
    %56 = vector.broadcast %3 : vector<1x128xf32> to vector<16x128xf32>
    %57 = arith.addf %55, %56 : vector<16x128xf32>
    %cst_54 = arith.constant dense<0.000000e+00> : vector<128xf32>
    %58 = vector.multi_reduction <add>, %57, %cst_54 [0] : vector<16x128xf32> to vector<128xf32>
    %59 = vector.shape_cast %58 : vector<128xf32> to vector<1x128xf32>
    %cst_55 = arith.constant 6.250000e-02 : f32
    %60 = vector.broadcast %cst_55 : f32 to vector<1x128xf32>
    %61 = arith.mulf %59, %60 : vector<1x128xf32>
    %62 = arith.negf %61 : vector<1x128xf32>
    %63 = math.exp %62 : vector<1x128xf32>
    %cst_56 = arith.constant 1.000000e+00 : f32
    %64 = vector.broadcast %cst_56 : f32 to vector<1x128xf32>
    %65 = arith.addf %64, %63 : vector<1x128xf32>
    %66 = arith.divf %64, %65 : vector<1x128xf32>
    %67 = arith.addf %29, %57 : vector<16x128xf32>
    %cst_57 = arith.constant 5.000000e-01 : f32
    %68 = vector.broadcast %cst_57 : f32 to vector<16x128xf32>
    %69 = arith.mulf %67, %68 : vector<16x128xf32>
    %cst_58 = arith.constant 0.000000e+00 : f32
    %70 = vector.broadcast %cst_58 : f32 to vector<16x128xf32>
    %71 = arith.cmpf ogt, %69, %70 : vector<16x128xf32>
    %cst_59 = arith.constant 0.000000e+00 : f32
    %72 = vector.broadcast %cst_59 : f32 to vector<16x128xf32>
    %73 = arith.minimumf %69, %72 : vector<16x128xf32>
    %74 = math.exp %73 : vector<16x128xf32>
    %cst_60 = arith.constant 1.000000e+00 : f32
    %75 = vector.broadcast %cst_60 : f32 to vector<16x128xf32>
    %76 = arith.subf %74, %75 : vector<16x128xf32>
    %77 = arith.select %71, %69, %76 : vector<16x128xi1>, vector<16x128xf32>
    %c0_61 = arith.constant 0 : index
    %c0_62 = arith.constant 0 : index
    %78 = vector.load %arg16[%c0_61, %c0_62] : memref<16x128xf32, #tpu.memory_space<vmem>>, vector<16x128xf32>
    tpu.vector_store %arg16[%c0_61, %c0_62], %77 {strides = array<i32>} : memref<16x128xf32, #tpu.memory_space<vmem>>, vector<16x128xf32>,
    %79 = arith.subf %67, %29 : vector<16x128xf32>
    %cst_63 = arith.constant 1.000000e+00 : f32
    %80 = vector.broadcast %cst_63 : f32 to vector<16x128xf32>
    %81 = arith.mulf %79, %80 : vector<16x128xf32>
    %cst_64 = arith.constant dense<0.000000e+00> : vector<16x128xf32>
    %82 = tpu.matmul %29, %4, %cst_64 {dimension_numbers = #tpu.dot_dimension_numbers<[1], [0], [0], [1], [0, 0, 1, 1], [], []>} : vector<16x128xf32>, vector<128x128xf32>, vector<16x128xf32> -> vector<16x128xf32>
    %cst_65 = arith.constant dense<0.000000e+00> : vector<16x128xf32>
    %83 = tpu.matmul %81, %4, %cst_65 {dimension_numbers = #tpu.dot_dimension_numbers<[1], [0], [0], [1], [0, 0, 1, 1], [], []>} : vector<16x128xf32>, vector<128x128xf32>, vector<16x128xf32> -> vector<16x128xf32>
    %84 = tpu.concatenate %82, %83 in 1 : vector<16x128xf32>, vector<16x128xf32> -> vector<16x256xf32>
    %cst_66 = arith.constant dense<0.000000e+00> : vector<16x256xf32>
    %85 = tpu.matmul %12, %84, %cst_66 {dimension_numbers = #tpu.dot_dimension_numbers<[1], [0], [0], [1], [0, 0, 1, 1], [], []>} : vector<16x16xf32>, vector<16x256xf32>, vector<16x256xf32> -> vector<16x256xf32>
    %86 = vector.extract_strided_slice %85 {offsets = [0, 0], sizes = [16, 128], strides = [1, 1]} : vector<16x256xf32> to vector<16x128xf32>
    %87 = vector.broadcast %5 : vector<1x128xf32> to vector<16x128xf32>
    %88 = arith.addf %86, %87 : vector<16x128xf32>
    %89 = vector.extract_strided_slice %85 {offsets = [0, 128], sizes = [16, 128], strides = [1, 1]} : vector<16x256xf32> to vector<16x128xf32>
    %90 = vector.broadcast %5 : vector<1x128xf32> to vector<16x128xf32>
    %91 = arith.addf %89, %90 : vector<16x128xf32>
    %cst_67 = arith.constant dense<0.000000e+00> : vector<16x16xf32>
    %92 = tpu.matmul %88, %6, %cst_67 {dimension_numbers = #tpu.dot_dimension_numbers<[1], [0], [0], [1], [0, 0, 1, 1], [], []>} : vector<16x128xf32>, vector<128x16xf32>, vector<16x16xf32> -> vector<16x16xf32>
    %cst_68 = arith.constant dense<0.000000e+00> : vector<16x16xf32>
    %93 = tpu.matmul %91, %6, %cst_68 {dimension_numbers = #tpu.dot_dimension_numbers<[1], [0], [0], [1], [0, 0, 1, 1], [], []>} : vector<16x128xf32>, vector<128x16xf32>, vector<16x16xf32> -> vector<16x16xf32>
    %94 = tpu.concatenate %92, %93 in 1 : vector<16x16xf32>, vector<16x16xf32> -> vector<16x32xf32>
    %cst_69 = arith.constant dense<0.000000e+00> : vector<16x32xf32>
    %95 = tpu.matmul %12, %94, %cst_69 {dimension_numbers = #tpu.dot_dimension_numbers<[1], [0], [0], [1], [0, 0, 1, 1], [], []>} : vector<16x16xf32>, vector<16x32xf32>, vector<16x32xf32> -> vector<16x32xf32>
    %96 = vector.extract_strided_slice %95 {offsets = [0, 0], sizes = [16, 16], strides = [1, 1]} : vector<16x32xf32> to vector<16x16xf32>
    %97 = vector.broadcast %7 : vector<1x16xf32> to vector<16x16xf32>
    %98 = arith.addf %96, %97 : vector<16x16xf32>
    %99 = vector.broadcast %10 : vector<1x32xf32> to vector<16x32xf32>
    %100 = arith.addf %95, %99 : vector<16x32xf32>
    %cst_70 = arith.constant dense<0.000000e+00> : vector<16x16xf32>
    %101 = tpu.matmul %100, %8, %cst_70 {dimension_numbers = #tpu.dot_dimension_numbers<[1], [0], [0], [1], [0, 0, 1, 1], [], []>} : vector<16x32xf32>, vector<32x16xf32>, vector<16x16xf32> -> vector<16x16xf32>
    %102 = vector.broadcast %9 : vector<1x16xf32> to vector<16x16xf32>
    %103 = arith.addf %101, %102 : vector<16x16xf32>
    %104 = arith.subf %67, %57 : vector<16x128xf32>
    %cst_71 = arith.constant 1.000000e+00 : f32
    %105 = vector.broadcast %cst_71 : f32 to vector<16x128xf32>
    %106 = arith.mulf %104, %105 : vector<16x128xf32>
    %cst_72 = arith.constant dense<0.000000e+00> : vector<16x128xf32>
    %107 = tpu.matmul %57, %4, %cst_72 {dimension_numbers = #tpu.dot_dimension_numbers<[1], [0], [0], [1], [0, 0, 1, 1], [], []>} : vector<16x128xf32>, vector<128x128xf32>, vector<16x128xf32> -> vector<16x128xf32>
    %cst_73 = arith.constant dense<0.000000e+00> : vector<16x128xf32>
    %108 = tpu.matmul %106, %4, %cst_73 {dimension_numbers = #tpu.dot_dimension_numbers<[1], [0], [0], [1], [0, 0, 1, 1], [], []>} : vector<16x128xf32>, vector<128x128xf32>, vector<16x128xf32> -> vector<16x128xf32>
    %109 = tpu.concatenate %107, %108 in 1 : vector<16x128xf32>, vector<16x128xf32> -> vector<16x256xf32>
    %cst_74 = arith.constant dense<0.000000e+00> : vector<16x256xf32>
    %110 = tpu.matmul %40, %109, %cst_74 {dimension_numbers = #tpu.dot_dimension_numbers<[1], [0], [0], [1], [0, 0, 1, 1], [], []>} : vector<16x16xf32>, vector<16x256xf32>, vector<16x256xf32> -> vector<16x256xf32>
    %111 = vector.extract_strided_slice %110 {offsets = [0, 0], sizes = [16, 128], strides = [1, 1]} : vector<16x256xf32> to vector<16x128xf32>
    %112 = vector.broadcast %5 : vector<1x128xf32> to vector<16x128xf32>
    %113 = arith.addf %111, %112 : vector<16x128xf32>
    %114 = vector.extract_strided_slice %110 {offsets = [0, 128], sizes = [16, 128], strides = [1, 1]} : vector<16x256xf32> to vector<16x128xf32>
    %115 = vector.broadcast %5 : vector<1x128xf32> to vector<16x128xf32>
    %116 = arith.addf %114, %115 : vector<16x128xf32>
    %cst_75 = arith.constant dense<0.000000e+00> : vector<16x16xf32>
    %117 = tpu.matmul %113, %6, %cst_75 {dimension_numbers = #tpu.dot_dimension_numbers<[1], [0], [0], [1], [0, 0, 1, 1], [], []>} : vector<16x128xf32>, vector<128x16xf32>, vector<16x16xf32> -> vector<16x16xf32>
    %cst_76 = arith.constant dense<0.000000e+00> : vector<16x16xf32>
    %118 = tpu.matmul %116, %6, %cst_76 {dimension_numbers = #tpu.dot_dimension_numbers<[1], [0], [0], [1], [0, 0, 1, 1], [], []>} : vector<16x128xf32>, vector<128x16xf32>, vector<16x16xf32> -> vector<16x16xf32>
    %119 = tpu.concatenate %117, %118 in 1 : vector<16x16xf32>, vector<16x16xf32> -> vector<16x32xf32>
    %cst_77 = arith.constant dense<0.000000e+00> : vector<16x32xf32>
    %120 = tpu.matmul %40, %119, %cst_77 {dimension_numbers = #tpu.dot_dimension_numbers<[1], [0], [0], [1], [0, 0, 1, 1], [], []>} : vector<16x16xf32>, vector<16x32xf32>, vector<16x32xf32> -> vector<16x32xf32>
    %121 = vector.extract_strided_slice %120 {offsets = [0, 0], sizes = [16, 16], strides = [1, 1]} : vector<16x32xf32> to vector<16x16xf32>
    %122 = vector.broadcast %7 : vector<1x16xf32> to vector<16x16xf32>
    %123 = arith.addf %121, %122 : vector<16x16xf32>
    %124 = vector.broadcast %10 : vector<1x32xf32> to vector<16x32xf32>
    %125 = arith.addf %120, %124 : vector<16x32xf32>
    %cst_78 = arith.constant dense<0.000000e+00> : vector<16x16xf32>
    %126 = tpu.matmul %125, %8, %cst_78 {dimension_numbers = #tpu.dot_dimension_numbers<[1], [0], [0], [1], [0, 0, 1, 1], [], []>} : vector<16x32xf32>, vector<32x16xf32>, vector<16x16xf32> -> vector<16x16xf32>
    %127 = vector.broadcast %9 : vector<1x16xf32> to vector<16x16xf32>
    %128 = arith.addf %126, %127 : vector<16x16xf32>
    %129 = arith.addf %103, %128 : vector<16x16xf32>
    %cst_79 = arith.constant 5.000000e-01 : f32
    %130 = vector.broadcast %cst_79 : f32 to vector<16x16xf32>
    %131 = arith.mulf %129, %130 : vector<16x16xf32>
    %132 = arith.negf %131 : vector<16x16xf32>
    %133 = math.exp %132 : vector<16x16xf32>
    %cst_80 = arith.constant 1.000000e+00 : f32
    %134 = vector.broadcast %cst_80 : f32 to vector<16x16xf32>
    %135 = arith.addf %134, %133 : vector<16x16xf32>
    %136 = arith.divf %134, %135 : vector<16x16xf32>
    %c0_81 = arith.constant 0 : index
    %c0_82 = arith.constant 0 : index
    %137 = vector.load %arg15[%c0_81, %c0_82] : memref<16x16xf32, #tpu.memory_space<vmem>>, vector<16x16xf32>
    tpu.vector_store %arg15[%c0_81, %c0_82], %136 {strides = array<i32>} : memref<16x16xf32, #tpu.memory_space<vmem>>, vector<16x16xf32>,
    %c0_83 = arith.constant 0 : index
    %c0_84 = arith.constant 0 : index
    %c0_85 = arith.constant 0 : index
    %138 = vector.load %arg14[%c0_83, %c0_84, %c0_85] : memref<2x128x128xf32, #tpu.memory_space<vmem>>, vector<1x128x128xf32>
    %139 = vector.shape_cast %138 : vector<1x128x128xf32> to vector<128x128xf32>
    %cst_86 = arith.constant dense<0.000000e+00> : vector<1x128xf32>
    %140 = tpu.matmul %38, %139, %cst_86 {dimension_numbers = #tpu.dot_dimension_numbers<[1], [1], [0], [0], [0, 0, 1, 0], [], []>} : vector<1x128xf32>, vector<128x128xf32>, vector<1x128xf32> -> vector<1x128xf32>
    %c1_87 = arith.constant 1 : index
    %c0_88 = arith.constant 0 : index
    %c0_89 = arith.constant 0 : index
    %141 = vector.load %arg14[%c1_87, %c0_88, %c0_89] : memref<2x128x128xf32, #tpu.memory_space<vmem>>, vector<1x128x128xf32>
    %142 = vector.shape_cast %141 : vector<1x128x128xf32> to vector<128x128xf32>
    %cst_90 = arith.constant dense<0.000000e+00> : vector<1x128xf32>
    %143 = tpu.matmul %66, %142, %cst_90 {dimension_numbers = #tpu.dot_dimension_numbers<[1], [1], [0], [0], [0, 0, 1, 0], [], []>} : vector<1x128xf32>, vector<128x128xf32>, vector<1x128xf32> -> vector<1x128xf32>
    %144 = tpu.concatenate %140, %143 in 0 : vector<1x128xf32>, vector<1x128xf32> -> vector<2x128xf32>
    %145 = tpu.concatenate %29, %57 in 0 : vector<16x128xf32>, vector<16x128xf32> -> vector<32x128xf32>
    %cst_91 = arith.constant dense<0.000000e+00> : vector<32x2xf32>
    %146 = tpu.matmul %145, %144, %cst_91 {dimension_numbers = #tpu.dot_dimension_numbers<[1], [1], [0], [0], [0, 0, 1, 0], [], []>} : vector<32x128xf32>, vector<2x128xf32>, vector<32x2xf32> -> vector<32x2xf32>
    %147 = arith.negf %146 : vector<32x2xf32>
    %148 = math.exp %147 : vector<32x2xf32>
    %cst_92 = arith.constant 1.000000e+00 : f32
    %149 = vector.broadcast %cst_92 : f32 to vector<32x2xf32>
    %150 = arith.addf %149, %148 : vector<32x2xf32>
    %151 = arith.divf %149, %150 : vector<32x2xf32>
    %152 = vector.extract_strided_slice %151 {offsets = [0, 0], sizes = [16, 2], strides = [1, 1]} : vector<32x2xf32> to vector<16x2xf32>
    %153 = vector.extract_strided_slice %151 {offsets = [16, 0], sizes = [16, 2], strides = [1, 1]} : vector<32x2xf32> to vector<16x2xf32>
    %154 = arith.addf %152, %153 : vector<16x2xf32>
    %cst_93 = arith.constant 1.000000e+00 : f32
    %155 = vector.broadcast %cst_93 : f32 to vector<16x2xf32>
    %156 = arith.divf %155, %154 : vector<16x2xf32>
    %157 = vector.extract_strided_slice %152 {offsets = [0, 0], sizes = [16, 1], strides = [1, 1]} : vector<16x2xf32> to vector<16x1xf32>
    %158 = vector.extract_strided_slice %156 {offsets = [0, 0], sizes = [16, 1], strides = [1, 1]} : vector<16x2xf32> to vector<16x1xf32>
    %159 = arith.mulf %157, %158 : vector<16x1xf32>
    %160 = vector.extract_strided_slice %153 {offsets = [0, 0], sizes = [16, 1], strides = [1, 1]} : vector<16x2xf32> to vector<16x1xf32>
    %161 = vector.extract_strided_slice %156 {offsets = [0, 0], sizes = [16, 1], strides = [1, 1]} : vector<16x2xf32> to vector<16x1xf32>
    %162 = arith.mulf %160, %161 : vector<16x1xf32>
    %163 = vector.extract_strided_slice %152 {offsets = [0, 1], sizes = [16, 1], strides = [1, 1]} : vector<16x2xf32> to vector<16x1xf32>
    %164 = vector.extract_strided_slice %156 {offsets = [0, 1], sizes = [16, 1], strides = [1, 1]} : vector<16x2xf32> to vector<16x1xf32>
    %165 = arith.mulf %163, %164 : vector<16x1xf32>
    %166 = vector.extract_strided_slice %153 {offsets = [0, 1], sizes = [16, 1], strides = [1, 1]} : vector<16x2xf32> to vector<16x1xf32>
    %167 = vector.extract_strided_slice %156 {offsets = [0, 1], sizes = [16, 1], strides = [1, 1]} : vector<16x2xf32> to vector<16x1xf32>
    %168 = arith.mulf %166, %167 : vector<16x1xf32>
    %169 = tpu.concatenate %159, %162, %165, %168 in 1 : vector<16x1xf32>, vector<16x1xf32>, vector<16x1xf32>, vector<16x1xf32> -> vector<16x4xf32>
    %cst_94 = arith.constant 0.000000e+00 : f32
    %170 = vector.broadcast %cst_94 : f32 to vector<16x124xf32>
    %171 = tpu.concatenate %169, %170 in 1 : vector<16x4xf32>, vector<16x124xf32> -> vector<16x128xf32>
    %c0_95 = arith.constant 0 : index
    %c0_96 = arith.constant 0 : index
    %172 = vector.load %arg17[%c0_95, %c0_96] : memref<16x128xf32, #tpu.memory_space<vmem>>, vector<16x128xf32>
    tpu.vector_store %arg17[%c0_95, %c0_96], %171 {strides = array<i32>} : memref<16x128xf32, #tpu.memory_space<vmem>>, vector<16x128xf32>,
    %cst_97 = arith.constant 0.000000e+00 : f32
    %173 = vector.broadcast %cst_97 : f32 to vector<1x1xf32>
    %174 = arith.subf %21, %98 : vector<16x16xf32>
    %175 = arith.mulf %174, %174 : vector<16x16xf32>
    %cst_98 = arith.constant dense<0.000000e+00> : vector<16xf32>
    %176 = vector.multi_reduction <add>, %175, %cst_98 [1] : vector<16x16xf32> to vector<16xf32>
    %177 = vector.shape_cast %176 : vector<16xf32> to vector<16x1xf32>
    %cst_99 = arith.constant dense<0.000000e+00> : vector<1xf32>
    %178 = vector.multi_reduction <add>, %177, %cst_99 [0] : vector<16x1xf32> to vector<1xf32>
    %179 = vector.shape_cast %178 : vector<1xf32> to vector<1x1xf32>
    %180 = math.sqrt %179 : vector<1x1xf32>
    %181 = arith.subf %25, %88 : vector<16x128xf32>
    %182 = arith.mulf %181, %181 : vector<16x128xf32>
    %cst_100 = arith.constant dense<0.000000e+00> : vector<16xf32>
    %183 = vector.multi_reduction <add>, %182, %cst_100 [1] : vector<16x128xf32> to vector<16xf32>
    %184 = vector.shape_cast %183 : vector<16xf32> to vector<16x1xf32>
    %cst_101 = arith.constant dense<0.000000e+00> : vector<1xf32>
    %185 = vector.multi_reduction <add>, %184, %cst_101 [0] : vector<16x1xf32> to vector<1xf32>
    %186 = vector.shape_cast %185 : vector<1xf32> to vector<1x1xf32>
    %187 = math.sqrt %186 : vector<1x1xf32>
    %188 = arith.addf %180, %187 : vector<1x1xf32>
    %cst_102 = arith.constant 5.000000e-01 : f32
    %189 = vector.broadcast %cst_102 : f32 to vector<1x1xf32>
    %190 = arith.mulf %189, %188 : vector<1x1xf32>
    %191 = arith.addf %173, %190 : vector<1x1xf32>
    %192 = arith.subf %49, %123 : vector<16x16xf32>
    %193 = arith.mulf %192, %192 : vector<16x16xf32>
    %cst_103 = arith.constant dense<0.000000e+00> : vector<16xf32>
    %194 = vector.multi_reduction <add>, %193, %cst_103 [1] : vector<16x16xf32> to vector<16xf32>
    %195 = vector.shape_cast %194 : vector<16xf32> to vector<16x1xf32>
    %cst_104 = arith.constant dense<0.000000e+00> : vector<1xf32>
    %196 = vector.multi_reduction <add>, %195, %cst_104 [0] : vector<16x1xf32> to vector<1xf32>
    %197 = vector.shape_cast %196 : vector<1xf32> to vector<1x1xf32>
    %198 = math.sqrt %197 : vector<1x1xf32>
    %199 = arith.subf %53, %113 : vector<16x128xf32>
    %200 = arith.mulf %199, %199 : vector<16x128xf32>
    %cst_105 = arith.constant dense<0.000000e+00> : vector<16xf32>
    %201 = vector.multi_reduction <add>, %200, %cst_105 [1] : vector<16x128xf32> to vector<16xf32>
    %202 = vector.shape_cast %201 : vector<16xf32> to vector<16x1xf32>
    %cst_106 = arith.constant dense<0.000000e+00> : vector<1xf32>
    %203 = vector.multi_reduction <add>, %202, %cst_106 [0] : vector<16x1xf32> to vector<1xf32>
    %204 = vector.shape_cast %203 : vector<1xf32> to vector<1x1xf32>
    %205 = math.sqrt %204 : vector<1x1xf32>
    %206 = arith.addf %198, %205 : vector<1x1xf32>
    %cst_107 = arith.constant 5.000000e-01 : f32
    %207 = vector.broadcast %cst_107 : f32 to vector<1x1xf32>
    %208 = arith.mulf %207, %206 : vector<1x1xf32>
    %209 = arith.addf %191, %208 : vector<1x1xf32>
    %cst_108 = arith.constant 0.000000e+00 : f32
    %210 = vector.broadcast %cst_108 : f32 to vector<1x1xf32>
    %211 = arith.subf %103, %128 : vector<16x16xf32>
    %212 = arith.mulf %211, %211 : vector<16x16xf32>
    %cst_109 = arith.constant dense<0.000000e+00> : vector<16xf32>
    %213 = vector.multi_reduction <add>, %212, %cst_109 [1] : vector<16x16xf32> to vector<16xf32>
    %214 = vector.shape_cast %213 : vector<16xf32> to vector<16x1xf32>
    %cst_110 = arith.constant dense<0.000000e+00> : vector<1xf32>
    %215 = vector.multi_reduction <add>, %214, %cst_110 [0] : vector<16x1xf32> to vector<1xf32>
    %216 = vector.shape_cast %215 : vector<1xf32> to vector<1x1xf32>
    %217 = math.sqrt %216 : vector<1x1xf32>
    %cst_111 = arith.constant 2.000000e+00 : f32
    %218 = vector.broadcast %cst_111 : f32 to vector<1x1xf32>
    %219 = arith.mulf %218, %217 : vector<1x1xf32>
    %220 = arith.addf %210, %219 : vector<1x1xf32>
    %221 = tpu.iota {dimensions = array<i32: 1>} : vector<1x128xi32>
    %c0_i32 = arith.constant 0 : i32
    %222 = vector.broadcast %c0_i32 : i32 to vector<1x128xi32>
    %223 = arith.cmpi eq, %221, %222 : vector<1x128xi32>
    %cst_112 = arith.constant 0.000000e+00 : f32
    %224 = vector.shape_cast %209 : vector<1x1xf32> to vector<1x1xf32>
    %225 = vector.broadcast %224 : vector<1x1xf32> to vector<1x128xf32>
    %226 = vector.broadcast %cst_112 : f32 to vector<1x128xf32>
    %227 = arith.select %223, %225, %226 : vector<1x128xi1>, vector<1x128xf32>
    %c1_i32 = arith.constant 1 : i32
    %228 = vector.broadcast %c1_i32 : i32 to vector<1x128xi32>
    %229 = arith.cmpi eq, %221, %228 : vector<1x128xi32>
    %cst_113 = arith.constant 0.000000e+00 : f32
    %230 = vector.shape_cast %220 : vector<1x1xf32> to vector<1x1xf32>
    %231 = vector.broadcast %230 : vector<1x1xf32> to vector<1x128xf32>
    %232 = vector.broadcast %cst_113 : f32 to vector<1x128xf32>
    %233 = arith.select %229, %231, %232 : vector<1x128xi1>, vector<1x128xf32>
    %234 = arith.addf %227, %233 : vector<1x128xf32>
    %c0_114 = arith.constant 0 : index
    %c0_115 = arith.constant 0 : index
    %235 = vector.load %arg18[%c0_114, %c0_115] : memref<1x128xf32, #tpu.memory_space<vmem>>, vector<1x128xf32>
    tpu.vector_store %arg18[%c0_114, %c0_115], %234 {strides = array<i32>} : memref<1x128xf32, #tpu.memory_space<vmem>>, vector<1x128xf32>,
    return
  }
}

</mosaic_0001>

<bundles_post_ra>
// kernel: net_forward.1
= control target key start
LH: loop header
LB: loop body
LE: loop exit
PB: predicated region body
PF: predicated region fallthrough
CT: control target
= control target key end

     0   :  { %s4741_s0 = inlined_call_operand.vmem [shape: f32[2,16,16], index: 0, kind: input, shape index: {}]   ;;  %s4742_s1 = inlined_call_operand.vmem [shape: f32[2,16,16], index: 1, kind: input, shape index: {}]   ;;  %s4743_s2 = inlined_call_operand.hbm [shape: f32[2,16,16], index: 2, kind: input, shape index: {}]   ;;  %s4744_s3 = inlined_call_operand.vmem [shape: f32[2,1,16], index: 3, kind: input, shape index: {}]   ;;  %s4745_s4 = inlined_call_operand.hbm [shape: f32[16,128], index: 4, kind: input, shape index: {}]   ;;  %s4746_s5 = inlined_call_operand.vmem [shape: f32[1,128], index: 5, kind: input, shape index: {}]   ;;  %s4747_s6 = inlined_call_operand.vmem [shape: f32[128,128], index: 6, kind: input, shape index: {}]   ;;  %s4748_s7 = inlined_call_operand.vmem [shape: f32[1,128], index: 7, kind: input, shape index: {}]   ;;  %s4749_s8 = inlined_call_operand.hbm [shape: f32[128,128], index: 8, kind: input, shape index: {}]   ;;  %s4750_s9 = inlined_call_operand.vmem [shape: f32[1,128], index: 9, kind: input, shape index: {}]   ;;  %s4751_s10 = inlined_call_operand.vmem [shape: f32[128,16], index: 10, kind: input, shape index: {}]   ;;  %s4752_s11 = inlined_call_operand.vmem [shape: f32[1,16], index: 11, kind: input, shape index: {}]   ;;  %s4753_s12 = inlined_call_operand.vmem [shape: f32[32,16], index: 12, kind: input, shape index: {}]   ;;  %s4754_s13 = inlined_call_operand.vmem [shape: f32[1,16], index: 13, kind: input, shape index: {}]   ;;  %s4755_s14 = inlined_call_operand.hbm [shape: f32[2,128,128], index: 14, kind: input, shape index: {}]   ;;  %s4756_s15 = inlined_call_operand.hbm [shape: f32[16,16], index: 15, kind: output, shape index: {0}]   ;;  %s4757_s16 = inlined_call_operand.hbm [shape: f32[16,128], index: 16, kind: output, shape index: {1}]   ;;  %s4758_s17 = inlined_call_operand.vmem [shape: f32[16,128], index: 17, kind: output, shape index: {2}]   ;;  %s4759_s18 = inlined_call_operand.vmem [shape: f32[1,128], index: 18, kind: output, shape index: {3}]  }
   0x1   :  { %4767 = sst [smem:[#allocation20_spill]] %s4741_s0 }
   0x2   :  { %4768 = sst [smem:[#allocation21_spill]] %s4742_s1 }
   0x3   :  { %4769 = sst [smem:[#allocation22_spill]] %s4743_s2 }
   0x4   :  { %24 = vsyncpa [#allocation3], 0 }
   0x5   :  { %25 = vsyncpa [#allocation6], 0 }
   0x6   :  { %26 = vsyncpa [#allocation9], 0 }
   0x7   :  { %27 = vsyncpa [#allocation4], 0 }
   0x8   :  { %28 = vsyncpa [#allocation12], 0  ;;  %s3738_s27 = smov [#allocation5]   ;;  %s3739_s29 = smov [#allocation2]  }
   0x9   :  { %s52_s28 = sshll.u32 %s3738_s27, 4  ;;  %s38_s30 = sshll.u32 %s3739_s29, 4  ;;  %s53_s28 = int_to_ptr.vmem [resolvable:$true] %s52_s28  ;;  %s39_s30 = int_to_ptr.vmem [resolvable:$true] %s38_s30 }
   0xa   :  { %s3616_s0 = scalar_lea.vmem %s53_s28, 256  ;;  %p3621_p1 = scmp.lt.s32.totalorder %s53_s28, %s53_s28 }
   0xb   :  { %p3617_p0 = scmp.ne.s32.totalorder %s53_s28, %s3616_s0  ;;  %p3622_p2 = scmp.lt.s32.totalorder %s3616_s0, %s3616_s0 }
   0xd   :  { %p3623_p3 = por %p3622_p2, %p3621_p1 }
   0xf   :  { %p3624_p4 = pnand %p3623_p3, %p3617_p0 }
  0x11   :  { %3627 = shalt.err (!%p3624_p4)
}
  0x12   :  { %s3740_s19 = smov 128   ;;  %s3741_s1 = smov 8  }
  0x13   :  { %58 = dma.hbm_to_vmem [thread:$0]  %s4745_s4, 256, %s53_s28, [#allocation6], %s3740_s19, %s3740_s19, %s3741_s1  }
  0x14   :  { %s3636_s22 = scalar_lea.vmem %s39_s30, 512  ;;  %p3641_p6 = scmp.lt.s32.totalorder %s39_s30, %s39_s30 }
  0x15   :  { %p3637_p5 = scmp.ne.s32.totalorder %s39_s30, %s3636_s22  ;;  %p3642_p7 = scmp.lt.s32.totalorder %s3636_s22, %s3636_s22 }
  0x17   :  { %p3643_p8 = por %p3642_p7, %p3641_p6 }
  0x19   :  { %p3644_p9 = pnand %p3643_p8, %p3637_p5 }
  0x1b   :  { %3647 = shalt.err (!%p3644_p9)
}
  0x1c   :  { %s4770_s24 = sld [smem:[#allocation22_spill]]  ;;  %s3742_s25 = smov [#allocation7]  }
  0x1d   :  { %s70_s26 = sshll.u32 %s3742_s25, 4  ;;  %s3743_s27 = smov [#allocation8]   ;;  %s71_s26 = int_to_ptr.vmem [resolvable:$true] %s70_s26 }
  0x1e   :  { %s92_s29 = sshll.u32 %s3743_s27, 4  ;;  %s3656_s4 = scalar_lea.vmem %s71_s26, 2048  ;;  %s93_s29 = int_to_ptr.vmem [resolvable:$true] %s92_s29 }
  0x1f   :  { %p3657_p10 = scmp.ne.s32.totalorder %s71_s26, %s3656_s4  ;;  %p3661_p11 = scmp.lt.s32.totalorder %s71_s26, %s71_s26 }
  0x20   :  { %p3662_p12 = scmp.lt.s32.totalorder %s3656_s4, %s3656_s4 }
  0x22   :  { %44 = dma.hbm_to_vmem [thread:$0]  %s4770_s24, 512, %s39_s30, [#allocation3], %s3740_s19, %s3740_s19, %s3741_s1  }
  0x23   :  { %p3663_p13 = por %p3662_p12, %p3661_p11 }
  0x25   :  { %p3664_p0 = pnand %p3663_p13, %p3657_p10 }
  0x27   :  { %3667 = shalt.err (!%p3664_p0)
}
  0x28   :  { %76 = dma.hbm_to_vmem [thread:$0]  %s4749_s8, 2048, %s71_s26, [#allocation6], %s3740_s19, %s3740_s19, %s3741_s1  }
  0x29   :  { %s3676_s30 = scalar_lea.vmem %s93_s29, 4096  ;;  %p3681_p2 = scmp.lt.s32.totalorder %s93_s29, %s93_s29 }
  0x2a   :  { %p3677_p1 = scmp.ne.s32.totalorder %s93_s29, %s3676_s30  ;;  %p3682_p3 = scmp.lt.s32.totalorder %s3676_s30, %s3676_s30 }
  0x2c   :  { %p3683_p4 = por %p3682_p3, %p3681_p2 }
  0x2e   :  { %p3684_p5 = pnand %p3683_p4, %p3677_p1 }
  0x30   :  { %3687 = shalt.err (!%p3684_p5)
}
  0x31   :  { %98 = dma.hbm_to_vmem [thread:$0]  %s4755_s14, 4096, %s93_s29, [#allocation9], %s3740_s19, %s3740_s19, %s3741_s1  }
  0x32   :  { %3728 = dma.done.wait [#allocation3], 512  }
  0x33   :  { %3729 = vsyncadd [#allocation3], 4294966784 }
  0x34   :  { %3730 = dma.done.wait [#allocation6], 2304  }
  0x35   :  { %3731 = vsyncadd [#allocation6], 4294964992 }
  0x36   :  { %3732 = dma.done.wait [#allocation9], 4096  }
  0x37   :  { %3733 = vsyncadd [#allocation9], 4294963200  ;;  %vm178_vm0 = vcmask 130048   ;;  %v185_v0 = vld [vmem:[#allocation2 + $0x8] sm:$0xff]  ;;  %v184_v1 = vld [vmem:[#allocation2] sm:$0xff]  ;;  %s4771_s2 = sld [smem:[#allocation20_spill]] }
  0x38   :  { %3024 = vmatprep.subr.mxu0 %v185_v0  ;;  %s4772_s26 = sld [smem:[#allocation21_spill]]  ;;  %v2704_v5 = vld [vmem:[%s4744_s3] ss:$0 sm:$0xff]  ;;  %v3903_v11 = vld [vmem:[#allocation5 + $0x8] sm:$0xff]  ;;  %v3914_v13 = vld [vmem:[%s4747_s6 + $0x78] sm:$0xff]  ;;  %s3745_s29 = smov 16  }
  0x39   :  { %3025 = vmatpush3.msra.mxu0 %v185_v0  ;;  %v3907_v12 = vld [vmem:[#allocation5] sm:$0xff]  ;;  %v3919_v14 = vld [vmem:[%s4747_s6 + $0x70] sm:$0xff]  ;;  %v3926_v15 = vld [vmem:[%s4747_s6 + $0x68] sm:$0xff]  ;;  %vm1543_vm3 = vcmask 261120   ;;  %vm3746_vm4 = vmmov 0   ;;  %vm2372_vm5 = vcmask 1040384  }
  0x3a   :  { %3026 = vmatprep.subr.mxu0 %v184_v1  ;;  %v3933_v16 = vld [vmem:[%s4747_s6 + $0x60] sm:$0xff]  ;;  %v3940_v17 = vld [vmem:[%s4747_s6 + $0x58] sm:$0xff]  ;;  %v3947_v18 = vld [vmem:[%s4747_s6 + $0x50] sm:$0xff] }
  0x3b   :  { %3027 = vmatpush3.msra.mxu0 %v184_v1  ;;  %v3954_v19 = vld [vmem:[%s4747_s6 + $0x48] sm:$0xff]  ;;  %v3961_v20 = vld [vmem:[%s4747_s6 + $0x40] sm:$0xff]  ;;  %v3968_v21 = vld [vmem:[%s4747_s6 + $0x38] sm:$0xff] }
  0x3c   :  { %3038 = vmatprep.subr.mxu0 %v3903_v11  ;;  %v3975_v22 = vld [vmem:[%s4747_s6 + $0x30] sm:$0xff]  ;;  %v3982_v23 = vld [vmem:[%s4747_s6 + $0x28] sm:$0xff]  ;;  %v3989_v24 = vld [vmem:[%s4747_s6 + $0x20] sm:$0xff] }
  0x3d   :  { %v182_v2 = vld [vmem:[%s4771_s2] sm:$0xff]  ;;  %v183_v3 = vld [vmem:[%s4771_s2 + $0x8] sm:$0xff]  ;;  %v3996_v25 = vld [vmem:[%s4747_s6 + $0x18] sm:$0xff] }
  0x3e   :  { %3028 = vmatprep.mubr.msk.f32.mxu0 %vm178_vm0, %v182_v2  ;;  %v3881_v4 = vld [vmem:[%s4772_s26] sm:$0xff]  ;;  %v3897_v10 = vld [vmem:[%s4772_s26 + $0x8] sm:$0xff]  ;;  %v4009_v28 = vld [vmem:[%s4747_s6 + $0x10] sm:$0xff] }
  0x3f   :  { %3029 = vmatmul.mubr.msk.f32.vlgmr.msra.gmra.mxu0 %vm178_vm0, %v183_v3  ;;  %3035 = vmatprep.mubr.msk.f32.mxu1 %vm178_vm0, %v3881_v4  ;;  %v4016_v29 = vld [vmem:[%s4747_s6 + $0x8] sm:$0xff]  ;;  %v4023_v30 = vld [vmem:[%s4747_s6] sm:$0xff]  ;;  %v620_v38 = vld [vmem:[#allocation2 + $0x18] sm:$0xff] }
  0x40   :  { %3039 = vmatpush3.msra.mxu0 %v3903_v11  ;;  %v4030_v32 = vld [vmem:[%s4746_s5] ss:$0 sm:$0xff]  ;;  %v2718_v39 = vld [vmem:[%s4771_s2 + $0x10] sm:$0xff]  ;;  %v2719_v41 = vld [vmem:[%s4771_s2 + $0x18] sm:$0xff]  ;;  %s3748_s5 = smov [#allocation11]  }
  0x41   :  { %3040 = vmatprep.subr.mxu0 %v3907_v12  ;;  %v619_v40 = vld [vmem:[#allocation2 + $0x10] sm:$0xff]  ;;  %v2721_v45 = vld [vmem:[%s4744_s3 + $0x1] ss:$0 sm:$0xff]  ;;  %v4075_v50 = vld [vmem:[%s4772_s26 + $0x18] sm:$0xff]  ;;  %s2678_s23 = sshll.u32 %s3748_s5, 4  ;;  %s2679_s23 = int_to_ptr.vmem [resolvable:$true] %s2678_s23 }
  0x42   :  { %3041 = vmatpush3.msra.mxu0 %v3907_v12  ;;  %v4053_v42 = vld [vmem:[%s4772_s26 + $0x10] sm:$0xff]  ;;  %v4127_v57 = vld [vmem:[#allocation7 + $0x78] sm:$0xff]  ;;  %v4130_v58 = vld [vmem:[#allocation7 + $0x70] sm:$0xff] }
  0x43   :  { %v4134_v59 = vld [vmem:[#allocation7 + $0x68] sm:$0xff]  ;;  %v4138_v60 = vld [vmem:[#allocation7 + $0x60] sm:$0xff]  ;;  %v4142_v61 = vld [vmem:[#allocation7 + $0x58] sm:$0xff] }
  0x44   :  { %v4146_v62 = vld [vmem:[#allocation7 + $0x50] sm:$0xff]  ;;  %v4150_v63 = vld [vmem:[#allocation7 + $0x48] sm:$0xff]  ;;  %v4154_v0 = vld [vmem:[#allocation7 + $0x40] sm:$0xff] }
  0x45   :  { %v4158_v1 = vld [vmem:[#allocation7 + $0x38] sm:$0xff]  ;;  %v4162_v2 = vld [vmem:[#allocation7 + $0x30] sm:$0xff]  ;;  %v4166_v3 = vld [vmem:[#allocation7 + $0x28] sm:$0xff] }
  0xff   :  { %v3030_v6 = vpop.f32.mrf.mxu0 }
 0x100   :  { %v3888_v7 = vadd.f32 %v3030_v6, %v2704_v5  ;;  %v4174_v6 = vld [vmem:[#allocation7 + $0x18] sm:$0xff] }
 0x101   :  { %v265_v8 = vpop.f32.mrf.mxu0 }
 0x102   :  { %v3890_v9 = vadd.f32 %v2704_v5, %v265_v8  ;;  %3031 = vmatprep.subr.mxu1 %v3888_v7  ;;  %v4170_v5 = vld [vmem:[#allocation7 + $0x20] sm:$0xff]  ;;  %v4178_v8 = vld [vmem:[#allocation7 + $0x10] sm:$0xff] }
 0x103   :  { %3032 = vmatpush3.msra.mxu1 %v3888_v7 }
 0x104   :  { %3033 = vmatprep.subr.mxu1 %v3890_v9 }
 0x105   :  { %3034 = vmatpush3.msra.mxu1 %v3890_v9 }
 0x106   :  { %3036 = vmatmul.mubr.msk.f32.vlgmr.msra.gmra.mxu1 %vm178_vm0, %v3897_v10  ;;  %3045 = vmatprep.subr.mxu1 %v3914_v13 }
 0x107   :  { %3046 = vmatpush3.msra.mxu1 %v3914_v13 }
 0x108   :  { %3047 = vmatprep.subr.mxu1 %v3919_v14 }
 0x109   :  { %3048 = vmatpush3.msra.mxu1 %v3919_v14 }
 0x10a   :  { %3049 = vmatprep.subr.mxu1 %v3926_v15 }
 0x10b   :  { %3050 = vmatpush3.msra.mxu1 %v3926_v15 }
 0x10c   :  { %3051 = vmatprep.subr.mxu1 %v3933_v16 }
 0x10d   :  { %3052 = vmatpush3.msra.mxu1 %v3933_v16 }
 0x10e   :  { %3053 = vmatprep.subr.mxu1 %v3940_v17 }
 0x10f   :  { %3054 = vmatpush3.msra.mxu1 %v3940_v17 }
 0x110   :  { %3055 = vmatprep.subr.mxu1 %v3947_v18 }
 0x111   :  { %3056 = vmatpush3.msra.mxu1 %v3947_v18 }
 0x112   :  { %3057 = vmatprep.subr.mxu1 %v3954_v19 }
 0x113   :  { %3058 = vmatpush3.msra.mxu1 %v3954_v19 }
 0x114   :  { %3059 = vmatprep.subr.mxu1 %v3961_v20 }
 0x115   :  { %3060 = vmatpush3.msra.mxu1 %v3961_v20 }
 0x116   :  { %3061 = vmatprep.subr.mxu1 %v3968_v21 }
 0x117   :  { %3062 = vmatpush3.msra.mxu1 %v3968_v21 }
 0x118   :  { %3063 = vmatprep.subr.mxu1 %v3975_v22 }
 0x119   :  { %3064 = vmatpush3.msra.mxu1 %v3975_v22 }
 0x11a   :  { %3065 = vmatprep.subr.mxu1 %v3982_v23 }
 0x11b   :  { %3066 = vmatpush3.msra.mxu1 %v3982_v23 }
 0x11c   :  { %3067 = vmatprep.subr.mxu1 %v3989_v24 }
 0x11d   :  { %3068 = vmatpush3.msra.mxu1 %v3989_v24 }
 0x11e   :  { %3069 = vmatprep.subr.mxu1 %v3996_v25 }
 0x11f   :  { %3070 = vmatpush3.msra.mxu1 %v3996_v25 }
 0x120   :  { %3071 = vmatprep.subr.mxu1 %v4009_v28 }
 0x121   :  { %3072 = vmatpush3.msra.mxu1 %v4009_v28 }
 0x122   :  { %3073 = vmatprep.subr.mxu1 %v4016_v29 }
 0x123   :  { %3074 = vmatpush3.msra.mxu1 %v4016_v29 }
 0x124   :  { %3075 = vmatprep.subr.mxu1 %v4023_v30 }
 0x125   :  { %3076 = vmatpush3.msra.mxu1 %v4023_v30 }
 0x1c6   :  { %v3037_v26 = vpop.f32.mrf.mxu1 }
 0x1c8   :  { %v346_v27 = vpop.f32.mrf.mxu1 }
 0x1c9   :  { %3042 = vmatprep.mubr.msk.f32.mxu0 %vm178_vm0, %v346_v27 }
 0x1ca   :  { %3043 = vmatmul.mubr.msk.f32.vlgmr.msra.gmra.mxu0 %vm178_vm0, %v3037_v26 }
 0x1cb   :  { %3084 = vmatprep.mubr.msk.f32.mxu0 %vm178_vm0, %v3881_v4 }
 0x28a   :  { %v3044_v31 = vpop.f32.mrf.mxu0 }
 0x28b   :  { %v4036_v35 = vadd.f32 %v3044_v31, %v4030_v32 }
 0x28c   :  { %v433_v33 = vpop.f32.mrf.mxu0 }
 0x28d   :  { %v4033_v34 = vadd.f32 %v4030_v32, %v433_v33 }
 0x28f   :  { %3077 = vmatprep.mubr.f32.mxu1 %v4033_v34 }
 0x290   :  { %3078 = vmatmul.mubr.f32.vlgmr.msra.gmra.mxu1 %v4036_v35 }
 0x291   :  { %3147 = vmatprep.mubr.msk.f32.mxu1 %vm178_vm0, %v4053_v42 }
 0x350   :  { %v3079_v36 = vpop.f32.mrf.mxu1 }
 0x351   :  { %3080 = vmatprep.subr.mxu0 %v3079_v36 }
 0x352   :  { %v508_v37 = vpop.f32.mrf.mxu1  ;;  %3081 = vmatpush3.msra.mxu0 %v3079_v36 }
 0x353   :  { %3082 = vmatprep.subr.mxu0 %v508_v37 }
 0x354   :  { %3083 = vmatpush3.msra.mxu0 %v508_v37 }
 0x355   :  { %3085 = vmatmul.mubr.msk.f32.vlgmr.msra.gmra.mxu0 %vm178_vm0, %v3897_v10  ;;  %3087 = vmatprep.subr.mxu0 %v620_v38 }
 0x356   :  { %3088 = vmatpush3.msra.mxu0 %v620_v38  ;;  %3091 = vmatprep.mubr.msk.f32.mxu0 %vm178_vm0, %v2718_v39 }
 0x357   :  { %3089 = vmatprep.subr.mxu0 %v619_v40 }
 0x358   :  { %3090 = vmatpush3.msra.mxu0 %v619_v40  ;;  %v4763_v40 = vmov 0.0  }
 0x359   :  { %3092 = vmatmul.mubr.msk.f32.vlgmr.msra.gmra.mxu0 %vm178_vm0, %v2719_v41  ;;  %v4258_v41 = vld [vmem:[%s4751_s10 + $0x78] sm:$0xff] }
 0x35a   :  { %3098 = vmatprep.mubr.msk.f32.mxu0 %vm178_vm0, %v4053_v42 }
 0x415   :  { %v4059_v43 = vpop.f32.mrf.mxu0 }
 0x417   :  { %v4061_v44 = vpop.f32.mrf.mxu0 }
 0x419   :  { %v3093_v46 = vpop.f32.mrf.mxu0 }
 0x41a   :  { %v4066_v47 = vadd.f32 %v3093_v46, %v2721_v45  ;;  %v4284_v46 = vld [vmem:[%s4751_s10 + $0x58] sm:$0xff] }
 0x41b   :  { %v701_v48 = vpop.f32.mrf.mxu0 }
 0x41c   :  { %4773 = vst [vmem:[#allocation18_spill] sm:$0xff] %v4066_v47  ;;  %v4068_v49 = vadd.f32 %v2721_v45, %v701_v48  ;;  %3094 = vmatprep.subr.mxu0 %v4066_v47  ;;  %v4277_v45 = vld [vmem:[%s4751_s10 + $0x60] sm:$0xff]  ;;  %v4291_v48 = vld [vmem:[%s4751_s10 + $0x50] sm:$0xff] }
 0x41d   :  { %3095 = vmatpush3.msra.mxu0 %v4066_v47 }
 0x41e   :  { %4774 = vst [vmem:[#allocation19_spill] sm:$0xff] %v4068_v49  ;;  %3096 = vmatprep.subr.mxu0 %v4068_v49 }
 0x41f   :  { %3097 = vmatpush3.msra.mxu0 %v4068_v49 }
 0x420   :  { %3099 = vmatmul.mubr.msk.f32.vlgmr.msra.gmra.mxu0 %vm178_vm0, %v4075_v50  ;;  %3101 = vmatprep.subr.mxu0 %v3903_v11 }
 0x421   :  { %3102 = vmatpush3.msra.mxu0 %v3903_v11  ;;  %v4182_v11 = vld [vmem:[#allocation7 + $0x8] sm:$0xff] }
 0x422   :  { %3103 = vmatprep.subr.mxu0 %v3907_v12 }
 0x423   :  { %3104 = vmatpush3.msra.mxu0 %v3907_v12  ;;  %v4186_v12 = vld [vmem:[#allocation7] sm:$0xff] }
 0x424   :  { %3108 = vmatprep.subr.mxu0 %v3914_v13 }
 0x4e0   :  { %v3100_v51 = vpop.f32.mrf.mxu0 }
 0x4e2   :  { %v782_v52 = vpop.f32.mrf.mxu0 }
 0x4e3   :  { %3105 = vmatprep.mubr.msk.f32.mxu0 %vm178_vm0, %v782_v52  ;;  %v4305_v52 = vld [vmem:[%s4751_s10 + $0x40] sm:$0xff] }
 0x4e4   :  { %3106 = vmatmul.mubr.msk.f32.vlgmr.msra.gmra.mxu0 %vm178_vm0, %v3100_v51  ;;  %v4298_v51 = vld [vmem:[%s4751_s10 + $0x48] sm:$0xff] }
 0x4e5   :  { %3109 = vmatpush3.msra.mxu0 %v3914_v13 }
 0x4e6   :  { %3110 = vmatprep.subr.mxu0 %v3919_v14 }
 0x4e7   :  { %3111 = vmatpush3.msra.mxu0 %v3919_v14 }
 0x4e8   :  { %3112 = vmatprep.subr.mxu0 %v3926_v15 }
 0x4e9   :  { %3113 = vmatpush3.msra.mxu0 %v3926_v15  ;;  %v2712_v15 = vld [vmem:[%s4748_s7] ss:$0 sm:$0xff] }
 0x4ea   :  { %3114 = vmatprep.subr.mxu0 %v3933_v16 }
 0x4eb   :  { %3115 = vmatpush3.msra.mxu0 %v3933_v16  ;;  %v4195_v16 = vadd.f32 %v2712_v15, %v4061_v44  ;;  %v4270_v44 = vld [vmem:[%s4751_s10 + $0x68] sm:$0xff] }
 0x4ec   :  { %3116 = vmatprep.subr.mxu0 %v3940_v17 }
 0x4ed   :  { %3117 = vmatpush3.msra.mxu0 %v3940_v17  ;;  %v4231_v17 = vadd.f32 %v4059_v43, %v2712_v15  ;;  %v4263_v43 = vld [vmem:[%s4751_s10 + $0x70] sm:$0xff] }
 0x4ee   :  { %3118 = vmatprep.subr.mxu0 %v3947_v18 }
 0x4ef   :  { %3119 = vmatpush3.msra.mxu0 %v3947_v18 }
 0x4f0   :  { %3120 = vmatprep.subr.mxu0 %v3954_v19 }
 0x4f1   :  { %3121 = vmatpush3.msra.mxu0 %v3954_v19 }
 0x4f2   :  { %3122 = vmatprep.subr.mxu0 %v3961_v20 }
 0x4f3   :  { %3123 = vmatpush3.msra.mxu0 %v3961_v20 }
 0x4f4   :  { %3124 = vmatprep.subr.mxu0 %v3968_v21 }
 0x4f5   :  { %3125 = vmatpush3.msra.mxu0 %v3968_v21 }
 0x4f6   :  { %3126 = vmatprep.subr.mxu0 %v3975_v22 }
 0x4f7   :  { %3127 = vmatpush3.msra.mxu0 %v3975_v22 }
 0x4f8   :  { %3128 = vmatprep.subr.mxu0 %v3982_v23 }
 0x4f9   :  { %3129 = vmatpush3.msra.mxu0 %v3982_v23 }
 0x4fa   :  { %3130 = vmatprep.subr.mxu0 %v3989_v24 }
 0x4fb   :  { %3131 = vmatpush3.msra.mxu0 %v3989_v24 }
 0x4fc   :  { %3132 = vmatprep.subr.mxu0 %v3996_v25 }
 0x4fd   :  { %3133 = vmatpush3.msra.mxu0 %v3996_v25 }
 0x4fe   :  { %3134 = vmatprep.subr.mxu0 %v4009_v28 }
 0x4ff   :  { %3135 = vmatpush3.msra.mxu0 %v4009_v28 }
 0x500   :  { %3136 = vmatprep.subr.mxu0 %v4016_v29 }
 0x501   :  { %3137 = vmatpush3.msra.mxu0 %v4016_v29 }
 0x502   :  { %3138 = vmatprep.subr.mxu0 %v4023_v30 }
 0x503   :  { %3139 = vmatpush3.msra.mxu0 %v4023_v30 }
 0x504   :  { %3185 = vmatprep.subr.mxu0 %v4127_v57 }
 0x5a4   :  { %v3107_v53 = vpop.f32.mrf.mxu0 }
 0x5a5   :  { %v4123_v56 = vadd.f32 %v3107_v53, %v4030_v32  ;;  %v4312_v53 = vld [vmem:[%s4751_s10 + $0x38] sm:$0xff] }
 0x5a6   :  { %v863_v54 = vpop.f32.mrf.mxu0 }
 0x5a7   :  { %v4120_v55 = vadd.f32 %v4030_v32, %v863_v54  ;;  %v4319_v54 = vld [vmem:[%s4751_s10 + $0x30] sm:$0xff] }
 0x5a9   :  { %3140 = vmatprep.mubr.f32.mxu0 %v4120_v55 }
 0x5aa   :  { %3141 = vmatmul.mubr.f32.vlgmr.msra.gmra.mxu0 %v4123_v56 }
 0x5ab   :  { %3186 = vmatpush3.msra.mxu0 %v4127_v57 }
 0x5ac   :  { %3187 = vmatprep.subr.mxu0 %v4130_v58 }
 0x5ad   :  { %3188 = vmatpush3.msra.mxu0 %v4130_v58 }
 0x5ae   :  { %3189 = vmatprep.subr.mxu0 %v4134_v59 }
 0x5af   :  { %3190 = vmatpush3.msra.mxu0 %v4134_v59 }
 0x5b0   :  { %3191 = vmatprep.subr.mxu0 %v4138_v60 }
 0x5b1   :  { %3192 = vmatpush3.msra.mxu0 %v4138_v60 }
 0x5b2   :  { %3193 = vmatprep.subr.mxu0 %v4142_v61 }
 0x5b3   :  { %3194 = vmatpush3.msra.mxu0 %v4142_v61 }
 0x5b4   :  { %3195 = vmatprep.subr.mxu0 %v4146_v62 }
 0x5b5   :  { %3196 = vmatpush3.msra.mxu0 %v4146_v62 }
 0x5b6   :  { %3197 = vmatprep.subr.mxu0 %v4150_v63 }
 0x5b7   :  { %3198 = vmatpush3.msra.mxu0 %v4150_v63 }
 0x5b8   :  { %3199 = vmatprep.subr.mxu0 %v4154_v0 }
 0x5b9   :  { %3200 = vmatpush3.msra.mxu0 %v4154_v0 }
 0x5ba   :  { %3201 = vmatprep.subr.mxu0 %v4158_v1 }
 0x5bb   :  { %3202 = vmatpush3.msra.mxu0 %v4158_v1 }
 0x5bc   :  { %3203 = vmatprep.subr.mxu0 %v4162_v2 }
 0x5bd   :  { %3204 = vmatpush3.msra.mxu0 %v4162_v2 }
 0x5be   :  { %3205 = vmatprep.subr.mxu0 %v4166_v3 }
 0x5bf   :  { %3206 = vmatpush3.msra.mxu0 %v4166_v3 }
 0x5c0   :  { %3207 = vmatprep.subr.mxu0 %v4170_v5 }
 0x5c1   :  { %3208 = vmatpush3.msra.mxu0 %v4170_v5 }
 0x5c2   :  { %3209 = vmatprep.subr.mxu0 %v4174_v6 }
 0x5c3   :  { %3210 = vmatpush3.msra.mxu0 %v4174_v6 }
 0x5c4   :  { %3211 = vmatprep.subr.mxu0 %v4178_v8 }
 0x5c5   :  { %3212 = vmatpush3.msra.mxu0 %v4178_v8 }
 0x5c6   :  { %3213 = vmatprep.subr.mxu0 %v4182_v11 }
 0x5c7   :  { %3214 = vmatpush3.msra.mxu0 %v4182_v11 }
 0x5c8   :  { %3215 = vmatprep.subr.mxu0 %v4186_v12 }
 0x5c9   :  { %3216 = vmatpush3.msra.mxu0 %v4186_v12 }
 0x5ca   :  { %3255 = vmatprep.subr.mxu0 %v4258_v41 }
 0x66a   :  { %v3142_v13 = vpop.f32.mrf.mxu0 }
 0x66b   :  { %3143 = vmatprep.subr.mxu1 %v3142_v13 }
 0x66c   :  { %v938_v14 = vpop.f32.mrf.mxu0  ;;  %3144 = vmatpush3.msra.mxu1 %v3142_v13  ;;  %v4326_v13 = vld [vmem:[%s4751_s10 + $0x28] sm:$0xff] }
 0x66d   :  { %3145 = vmatprep.subr.mxu1 %v938_v14 }
 0x66e   :  { %3146 = vmatpush3.msra.mxu1 %v938_v14  ;;  %v4333_v14 = vld [vmem:[%s4751_s10 + $0x20] sm:$0xff] }
 0x66f   :  { %3148 = vmatmul.mubr.msk.f32.vlgmr.msra.gmra.mxu1 %vm178_vm0, %v4075_v50  ;;  %3150 = vmatprep.subr.mxu1 %v4127_v57 }
 0x670   :  { %3151 = vmatpush3.msra.mxu1 %v4127_v57  ;;  %3182 = vmatprep.mubr.f32.mxu1 %v4195_v16 }
 0x671   :  { %3152 = vmatprep.subr.mxu1 %v4130_v58 }
 0x672   :  { %3153 = vmatpush3.msra.mxu1 %v4130_v58 }
 0x673   :  { %3154 = vmatprep.subr.mxu1 %v4134_v59 }
 0x674   :  { %3155 = vmatpush3.msra.mxu1 %v4134_v59 }
 0x675   :  { %3156 = vmatprep.subr.mxu1 %v4138_v60 }
 0x676   :  { %3157 = vmatpush3.msra.mxu1 %v4138_v60 }
 0x677   :  { %3158 = vmatprep.subr.mxu1 %v4142_v61 }
 0x678   :  { %3159 = vmatpush3.msra.mxu1 %v4142_v61 }
 0x679   :  { %3160 = vmatprep.subr.mxu1 %v4146_v62 }
 0x67a   :  { %3161 = vmatpush3.msra.mxu1 %v4146_v62 }
 0x67b   :  { %3162 = vmatprep.subr.mxu1 %v4150_v63 }
 0x67c   :  { %3163 = vmatpush3.msra.mxu1 %v4150_v63 }
 0x67d   :  { %3164 = vmatprep.subr.mxu1 %v4154_v0 }
 0x67e   :  { %3165 = vmatpush3.msra.mxu1 %v4154_v0 }
 0x67f   :  { %3166 = vmatprep.subr.mxu1 %v4158_v1 }
 0x680   :  { %3167 = vmatpush3.msra.mxu1 %v4158_v1 }
 0x681   :  { %3168 = vmatprep.subr.mxu1 %v4162_v2 }
 0x682   :  { %3169 = vmatpush3.msra.mxu1 %v4162_v2 }
 0x683   :  { %3170 = vmatprep.subr.mxu1 %v4166_v3 }
 0x684   :  { %3171 = vmatpush3.msra.mxu1 %v4166_v3 }
 0x685   :  { %3172 = vmatprep.subr.mxu1 %v4170_v5 }
 0x686   :  { %3173 = vmatpush3.msra.mxu1 %v4170_v5 }
 0x687   :  { %3174 = vmatprep.subr.mxu1 %v4174_v6 }
 0x688   :  { %3175 = vmatpush3.msra.mxu1 %v4174_v6 }
 0x689   :  { %3176 = vmatprep.subr.mxu1 %v4178_v8 }
 0x68a   :  { %3177 = vmatpush3.msra.mxu1 %v4178_v8 }
 0x68b   :  { %3178 = vmatprep.subr.mxu1 %v4182_v11 }
 0x68c   :  { %3179 = vmatpush3.msra.mxu1 %v4182_v11 }
 0x68d   :  { %3180 = vmatprep.subr.mxu1 %v4186_v12 }
 0x68e   :  { %3181 = vmatpush3.msra.mxu1 %v4186_v12 }
 0x68f   :  { %3183 = vmatmul.mubr.f32.vlgmr.msra.gmra.mxu1 %v4231_v17 }
 0x690   :  { %1270 = vmatprep.mubr.f32.mxu1 %v4763_v40 }
 0x72f   :  { %v3149_v18 = vpop.f32.mrf.mxu1 }
 0x730   :  { %v4236_v19 = vadd.f32 %v3149_v18, %v2712_v15 }
 0x731   :  { %v1013_v20 = vpop.f32.mrf.mxu1 }
 0x732   :  { %v4238_v21 = vadd.f32 %v2712_v15, %v1013_v20  ;;  %v4242_v22 = vadd.f32 %v4236_v19, %v4231_v17  ;;  %v4340_v15 = vld [vmem:[%s4751_s10 + $0x18] sm:$0xff] }
 0x734   :  { %v4246_v23 = vadd.f32 %v4238_v21, %v4195_v16  ;;  %v1039_v24 = vmul.f32 0.5, %v4242_v22  ;;  %v1055_v27 = vsub.f32 %v4242_v22, %v4231_v17 }
 0x736   :  { %v1054_v25 = vsub.f32 %v4246_v23, %v4195_v16  ;;  %v1038_v26 = vmul.f32 0.5, %v4246_v23  ;;  %v1043_v28 = vmin.f32 %v1039_v24, 0.0  ;;  %vm1041_vm1 = vcmp.gt.f32.partialorder %v1039_v24, 0.0 }
 0x737   :  { %v1625_v47 = vsub.f32 %v4246_v23, %v4238_v21 }
 0x738   :  { %3217 = vmatprep.mubr.f32.mxu0 %v1054_v25  ;;  %v1042_v29 = vmin.f32 %v1038_v26, 0.0  ;;  %v1046_v30 = vmul.f32 1.442695, %v1043_v28  ;;  %vm1040_vm2 = vcmp.gt.f32.partialorder %v1038_v26, 0.0  ;;  %v4397_v28 = vld [vmem:[%s4751_s10] sm:$0xff] }
 0x739   :  { %3218 = vmatmul.mubr.f32.vlgmr.msra.gmra.mxu0 %v1055_v27  ;;  %v4388_v27 = vld [vmem:[%s4751_s10 + $0x8] sm:$0xff] }
 0x73a   :  { %v1044_v31 = vmul.f32 1.442695, %v1042_v29  ;;  %3557 = vpow2.f32 %v1046_v30  ;;  %3256 = vmatpush3.msra.mxu0 %v4258_v41  ;;  %v4408_v29 = vld [vmem:[%s4750_s9] ss:$0 sm:$0xff] }
 0x73b   :  { %3257 = vmatprep.subr.mxu0 %v4263_v43 }
 0x73c   :  { %3559 = vpow2.f32 %v1044_v31  ;;  %3258 = vmatpush3.msra.mxu0 %v4263_v43 }
 0x73d   :  { %3259 = vmatprep.subr.mxu0 %v4270_v44 }
 0x73e   :  { %3260 = vmatpush3.msra.mxu0 %v4270_v44 }
 0x73f   :  { %3261 = vmatprep.subr.mxu0 %v4277_v45 }
 0x740   :  { %3262 = vmatpush3.msra.mxu0 %v4277_v45 }
 0x741   :  { %3263 = vmatprep.subr.mxu0 %v4284_v46 }
 0x742   :  { %3264 = vmatpush3.msra.mxu0 %v4284_v46 }
 0x743   :  { %3265 = vmatprep.subr.mxu0 %v4291_v48 }
 0x744   :  { %3266 = vmatpush3.msra.mxu0 %v4291_v48 }
 0x745   :  { %3267 = vmatprep.subr.mxu0 %v4298_v51 }
 0x746   :  { %3268 = vmatpush3.msra.mxu0 %v4298_v51 }
 0x747   :  { %v3558_v32 = vpop.eup %3557  ;;  %3269 = vmatprep.subr.mxu0 %v4305_v52 }
 0x748   :  { %v2732_v36 = vadd.f32 -1.0, %v3558_v32  ;;  %3270 = vmatpush3.msra.mxu0 %v4305_v52 }
 0x749   :  { %v3560_v33 = vpop.eup %3559  ;;  %3271 = vmatprep.subr.mxu0 %v4312_v53 }
 0x74a   :  { %v2731_v37 = vadd.f32 -1.0, %v3560_v33  ;;  %v1051_v38 = vsel %vm1041_vm1, %v1039_v24, %v2732_v36  ;;  %3272 = vmatpush3.msra.mxu0 %v4312_v53 }
 0x74b   :  { %1053 = vst [vmem:[#allocation11 + $0x8] sm:$0xff] %v1051_v38  ;;  %3273 = vmatprep.subr.mxu0 %v4319_v54 }
 0x74c   :  { %v1050_v39 = vsel %vm1040_vm2, %v1038_v26, %v2731_v37  ;;  %3274 = vmatpush3.msra.mxu0 %v4319_v54  ;;  %v4380_v26 = vld [vmem:[%s4751_s10 + $0x10] sm:$0xff] }
 0x74d   :  { %1052 = vst [vmem:[#allocation11] sm:$0xff] %v1050_v39  ;;  %3275 = vmatprep.subr.mxu0 %v4326_v13 }
 0x74e   :  { %3276 = vmatpush3.msra.mxu0 %v4326_v13 }
 0x74f   :  { %3277 = vmatprep.subr.mxu0 %v4333_v14  ;;  %v3184_v18 = vpop.f32.mrf.mxu1 }
 0x750   :  { %3278 = vmatpush3.msra.mxu0 %v4333_v14 }
 0x751   :  { %3279 = vmatprep.subr.mxu0 %v4340_v15  ;;  %v1122_v25 = vpop.f32.mrf.mxu1 }
 0x752   :  { %3280 = vmatpush3.msra.mxu0 %v4340_v15 }
 0x753   :  { %3281 = vmatprep.subr.mxu0 %v4380_v26 }
 0x754   :  { %3282 = vmatpush3.msra.mxu0 %v4380_v26 }
 0x755   :  { %3283 = vmatprep.subr.mxu0 %v4388_v27 }
 0x756   :  { %3284 = vmatpush3.msra.mxu0 %v4388_v27 }
 0x757   :  { %3285 = vmatprep.subr.mxu0 %v4397_v28 }
 0x758   :  { %3286 = vmatpush3.msra.mxu0 %v4397_v28 }
 0x759   :  { %3308 = vmatprep.subr.mxu0 %v4127_v57 }
 0x7f9   :  { %v3219_v20 = vpop.f32.mrf.mxu0 }
 0x7fa   :  { %1234 = vmatprep.subr.mxu1 %v3219_v20  ;;  %v164_v20 = vld [vmem:[%s4752_s11] sm:$0x1] }
 0x7fb   :  { %v1197_v24 = vpop.f32.mrf.mxu0  ;;  %1235 = vmatpush1.msra.mxu1 %v3184_v18 }
 0x7fc   :  { %1236 = vmatprep.subr.mxu1 %v1197_v24 }
 0x7fd   :  { %1237 = vmatpush1.msra.mxu1 %v1122_v25 }
 0x7fe   :  { %2733 = vmatmul.mubr.msk.f32.vlgmr.msra.gmra.mxu1 %vm178_vm0, %v3881_v4  ;;  %3220 = vmatprep.subr.mxu1 %v4258_v41 }
 0x7ff   :  { %1276 = vmatprep.mubr.f32.mxu1 %v4763_v40  ;;  %3221 = vmatpush3.msra.mxu1 %v4258_v41 }
 0x800   :  { %3222 = vmatprep.subr.mxu1 %v4263_v43 }
 0x801   :  { %3223 = vmatpush3.msra.mxu1 %v4263_v43 }
 0x802   :  { %2734 = vmatmul.mubr.msk.f32.gmra.mxu1 %vm178_vm0, %v3897_v10  ;;  %3224 = vmatprep.subr.mxu1 %v4270_v44 }
 0x803   :  { %3225 = vmatpush3.msra.mxu1 %v4270_v44 }
 0x804   :  { %3226 = vmatprep.subr.mxu1 %v4277_v45 }
 0x805   :  { %3227 = vmatpush3.msra.mxu1 %v4277_v45 }
 0x806   :  { %3228 = vmatprep.subr.mxu1 %v4284_v46 }
 0x807   :  { %3229 = vmatpush3.msra.mxu1 %v4284_v46 }
 0x808   :  { %3230 = vmatprep.subr.mxu1 %v4291_v48 }
 0x809   :  { %3231 = vmatpush3.msra.mxu1 %v4291_v48 }
 0x80a   :  { %3232 = vmatprep.subr.mxu1 %v4298_v51 }
 0x80b   :  { %3233 = vmatpush3.msra.mxu1 %v4298_v51 }
 0x80c   :  { %3234 = vmatprep.subr.mxu1 %v4305_v52 }
 0x80d   :  { %3235 = vmatpush3.msra.mxu1 %v4305_v52 }
 0x80e   :  { %3236 = vmatprep.subr.mxu1 %v4312_v53 }
 0x80f   :  { %3237 = vmatpush3.msra.mxu1 %v4312_v53 }
 0x810   :  { %3238 = vmatprep.subr.mxu1 %v4319_v54 }
 0x811   :  { %3239 = vmatpush3.msra.mxu1 %v4319_v54 }
 0x812   :  { %3240 = vmatprep.subr.mxu1 %v4326_v13 }
 0x813   :  { %3241 = vmatpush3.msra.mxu1 %v4326_v13 }
 0x814   :  { %3242 = vmatprep.subr.mxu1 %v4333_v14 }
 0x815   :  { %3243 = vmatpush3.msra.mxu1 %v4333_v14 }
 0x816   :  { %3244 = vmatprep.subr.mxu1 %v4340_v15 }
 0x817   :  { %3245 = vmatpush3.msra.mxu1 %v4340_v15 }
 0x818   :  { %3246 = vmatprep.subr.mxu1 %v4380_v26 }
 0x819   :  { %3247 = vmatpush3.msra.mxu1 %v4380_v26 }
 0x81a   :  { %3248 = vmatprep.subr.mxu1 %v4388_v27 }
 0x81b   :  { %3249 = vmatpush3.msra.mxu1 %v4388_v27 }
 0x81c   :  { %3250 = vmatprep.subr.mxu1 %v4397_v28 }
 0x81d   :  { %3251 = vmatpush3.msra.mxu1 %v4397_v28 }
 0x8be   :  { %v1272_v30 = vpop.f32.mrf.mxu1 }
 0x8bf   :  { %v4411_v31 = vadd.f32 %v4408_v29, %v1272_v30 }
 0x8c0   :  { %v1274_v32 = vpop.f32.mrf.mxu1 }
 0x8c1   :  { %v1291_v33 = vadd.f32 %v4408_v29, %v1274_v32  ;;  %3252 = vmatprep.mubr.f32.mxu1 %v4411_v31 }
 0x8c2   :  { %v1278_v36 = vpop.f32.mrf.mxu1 }
 0x8c3   :  { %v4416_v37 = vadd.f32 %v4408_v29, %v1278_v36  ;;  %3287 = vmatprep.mubr.f32.mxu0 %v1291_v33 }
 0x8c4   :  { %v1280_v38 = vpop.f32.mrf.mxu1 }
 0x8c5   :  { %v1292_v39 = vadd.f32 %v4408_v29, %v1280_v38  ;;  %3253 = vmatmul.mubr.f32.vlgmr.msra.gmra.mxu1 %v4416_v37 }
 0x8c6   :  { %3294 = vmatprep.mubr.msk.f32.mxu1 %vm178_vm0, %v3881_v4  ;;  %v4762_v4 = vlaneseq }
 0x8c7   :  { %3288 = vmatmul.mubr.f32.vlgmr.msra.gmra.mxu0 %v1292_v39 }
 0x8c8   :  { %3309 = vmatpush3.msra.mxu0 %v4127_v57  ;;  %3340 = vmatprep.mubr.f32.mxu0 %v4238_v21  ;;  %v172_v18 = vshrl.u32 %v4762_v4, 7 }
 0x8c9   :  { %3310 = vmatprep.subr.mxu0 %v4130_v58 }
 0x8ca   :  { %3311 = vmatpush3.msra.mxu0 %v4130_v58  ;;  %v173_v24 = vsub.s32 0, %v172_v18 }
 0x8cb   :  { %3312 = vmatprep.subr.mxu0 %v4134_v59 }
 0x8cc   :  { %3313 = vmatpush3.msra.mxu0 %v4134_v59  ;;  %v4461_v30 = vrot.slane %v164_v20, %v173_v24 }
 0x8cd   :  { %3314 = vmatprep.subr.mxu0 %v4138_v60 }
 0x8ce   :  { %3315 = vmatpush3.msra.mxu0 %v4138_v60  ;;  %175 = vrot.lane.b32.xlu1 %v4461_v30, %s3745_s29 }
 0x8cf   :  { %3316 = vmatprep.subr.mxu0 %v4142_v61 }
 0x8d0   :  { %3317 = vmatpush3.msra.mxu0 %v4142_v61 }
 0x8d1   :  { %3318 = vmatprep.subr.mxu0 %v4146_v62 }
 0x8d2   :  { %3319 = vmatpush3.msra.mxu0 %v4146_v62 }
 0x8d3   :  { %3320 = vmatprep.subr.mxu0 %v4150_v63 }
 0x8d4   :  { %3321 = vmatpush3.msra.mxu0 %v4150_v63 }
 0x8d5   :  { %3322 = vmatprep.subr.mxu0 %v4154_v0 }
 0x8d6   :  { %3323 = vmatpush3.msra.mxu0 %v4154_v0 }
 0x8d7   :  { %3324 = vmatprep.subr.mxu0 %v4158_v1 }
 0x8d8   :  { %3325 = vmatpush3.msra.mxu0 %v4158_v1 }
 0x8d9   :  { %3326 = vmatprep.subr.mxu0 %v4162_v2 }
 0x8da   :  { %3327 = vmatpush3.msra.mxu0 %v4162_v2 }
 0x8db   :  { %3328 = vmatprep.subr.mxu0 %v4166_v3 }
 0x8dc   :  { %3329 = vmatpush3.msra.mxu0 %v4166_v3 }
 0x8dd   :  { %3330 = vmatprep.subr.mxu0 %v4170_v5 }
 0x8de   :  { %3331 = vmatpush3.msra.mxu0 %v4170_v5 }
 0x8df   :  { %3332 = vmatprep.subr.mxu0 %v4174_v6 }
 0x8e0   :  { %3333 = vmatpush3.msra.mxu0 %v4174_v6 }
 0x8e1   :  { %3334 = vmatprep.subr.mxu0 %v4178_v8 }
 0x8e2   :  { %3335 = vmatpush3.msra.mxu0 %v4178_v8 }
 0x8e3   :  { %3336 = vmatprep.subr.mxu0 %v4182_v11 }
 0x8e4   :  { %3337 = vmatpush3.msra.mxu0 %v4182_v11 }
 0x8e5   :  { %3338 = vmatprep.subr.mxu0 %v4186_v12 }
 0x8e6   :  { %3339 = vmatpush3.msra.mxu0 %v4186_v12 }
 0x8e7   :  { %3341 = vmatmul.mubr.f32.vlgmr.msra.gmra.mxu0 %v4236_v19 }
 0x8e8   :  { %1841 = vmatprep.mubr.f32.mxu0 %v4763_v40 }
 0x985   :  { %v3254_v33 = vpop.f32.mrf.mxu1 }
 0x987   :  { %v3289_v25 = vpop.f32.mrf.mxu0  ;;  %v1359_v39 = vpop.f32.mrf.mxu1 }
 0x988   :  { %1447 = vrot.lane.b32.xlu0 %v3289_v25, %s3745_s29  ;;  %v4471_v25 = vld [vmem:[%s4753_s12 + $0x18] sm:$0xff] }
 0x989   :  { %v1434_v32 = vpop.f32.mrf.mxu0 }
 0x98c   :  { %1445 = vrot.lane.b32.xlu0 %v1434_v32, %s3745_s29  ;;  %v4476_v32 = vld [vmem:[%s4753_s12 + $0x10] sm:$0xff] }
 0x9fa   :  { %v1448_v36 = vpop.permute.xlu0 %1447 }
 0x9fb   :  { %v1452_v38 = vsel %vm178_vm0, %v3254_v33, %v1448_v36  ;;  %v176_v33 = vpop.permute.xlu1 %175 }
 0x9fc   :  { %3290 = vmatprep.subr.mxu1 %v1452_v38  ;;  %v179_v36 = vsel %vm178_vm0, %v164_v20, %v176_v33 }
 0x9fd   :  { %3291 = vmatpush3.msra.mxu1 %v1452_v38  ;;  %v4500_v38 = vrot.slane %v179_v36, %v173_v24  ;;  %v2208_v24 = vld [vmem:[#allocation8 + $0x60] sm:$0xff]  ;;  %v2205_v36 = vld [vmem:[#allocation8 + $0x48] sm:$0xff] }
 0x9fe   :  { %v1446_v18 = vpop.permute.xlu0 %1445 }
 0x9ff   :  { %v1451_v4 = vsel %vm178_vm0, %v1359_v39, %v1446_v18 }
 0xa00   :  { %3292 = vmatprep.subr.mxu1 %v1451_v4 }
 0xa01   :  { %3293 = vmatpush3.msra.mxu1 %v1451_v4  ;;  %v4487_v4 = vld [vmem:[%s4753_s12 + $0x8] sm:$0xff] }
 0xa02   :  { %3295 = vmatmul.mubr.msk.f32.vlgmr.msra.gmra.mxu1 %vm178_vm0, %v3897_v10  ;;  %3297 = vmatprep.subr.mxu1 %v4471_v25  ;;  %v4494_v10 = vld [vmem:[%s4753_s12] sm:$0xff] }
 0xa03   :  { %3298 = vmatpush3.msra.mxu1 %v4471_v25 }
 0xa04   :  { %3299 = vmatprep.subr.mxu1 %v4476_v32 }
 0xa05   :  { %3300 = vmatpush3.msra.mxu1 %v4476_v32 }
 0xa06   :  { %3301 = vmatprep.subr.mxu1 %v4487_v4 }
 0xa07   :  { %3302 = vmatpush3.msra.mxu1 %v4487_v4 }
 0xa08   :  { %3303 = vmatprep.subr.mxu1 %v4494_v10 }
 0xa09   :  { %3304 = vmatpush3.msra.mxu1 %v4494_v10 }
 0xa0a   :  { %3343 = vmatprep.subr.mxu1 %v4127_v57 }
 0xac2   :  { %v4502_v39 = vpop.f32.mrf.mxu1 }
 0xac3   :  { %v1536_v49 = vadd.f32 %v4502_v39, %v4500_v38 }
 0xac4   :  { %v4504_v18 = vpop.f32.mrf.mxu1 }
 0xac5   :  { %v1535_v40 = vadd.f32 %v4500_v38, %v4504_v18 }
 0xac7   :  { %3305 = vmatprep.mubr.msk.f32.mxu1 %vm1543_vm3, %v1535_v40 }
 0xac8   :  { %3306 = vmatmul.mubr.msk.f32.vlgmr.msra.gmra.mxu1 %vm1543_vm3, %v1536_v49 }
 0xac9   :  { %3344 = vmatpush3.msra.mxu1 %v4127_v57  ;;  %3375 = vmatprep.mubr.f32.mxu1 %v1625_v47  ;;  %v1626_v47 = vsub.f32 %v4242_v22, %v4236_v19 }
 0xaca   :  { %3345 = vmatprep.subr.mxu1 %v4130_v58 }
 0xacb   :  { %3346 = vmatpush3.msra.mxu1 %v4130_v58  ;;  %v3342_v58 = vpop.f32.mrf.mxu0 }
 0xacc   :  { %3347 = vmatprep.subr.mxu1 %v4134_v59 }
 0xacd   :  { %3348 = vmatpush3.msra.mxu1 %v4134_v59 }
 0xace   :  { %3349 = vmatprep.subr.mxu1 %v4138_v60 }
 0xacf   :  { %3350 = vmatpush3.msra.mxu1 %v4138_v60 }
 0xad0   :  { %3351 = vmatprep.subr.mxu1 %v4142_v61 }
 0xad1   :  { %3352 = vmatpush3.msra.mxu1 %v4142_v61  ;;  %v1693_v61 = vpop.f32.mrf.mxu0 }
 0xad2   :  { %3353 = vmatprep.subr.mxu1 %v4146_v62 }
 0xad3   :  { %3354 = vmatpush3.msra.mxu1 %v4146_v62  ;;  %v4775_v62 = vmov 0.0  }
 0xad4   :  { %3355 = vmatprep.subr.mxu1 %v4150_v63 }
 0xad5   :  { %3356 = vmatpush3.msra.mxu1 %v4150_v63 }
 0xad6   :  { %3357 = vmatprep.subr.mxu1 %v4154_v0 }
 0xad7   :  { %3358 = vmatpush3.msra.mxu1 %v4154_v0 }
 0xad8   :  { %3359 = vmatprep.subr.mxu1 %v4158_v1 }
 0xad9   :  { %3360 = vmatpush3.msra.mxu1 %v4158_v1 }
 0xada   :  { %3361 = vmatprep.subr.mxu1 %v4162_v2 }
 0xadb   :  { %3362 = vmatpush3.msra.mxu1 %v4162_v2 }
 0xadc   :  { %3363 = vmatprep.subr.mxu1 %v4166_v3 }
 0xadd   :  { %3364 = vmatpush3.msra.mxu1 %v4166_v3 }
 0xade   :  { %3365 = vmatprep.subr.mxu1 %v4170_v5 }
 0xadf   :  { %3366 = vmatpush3.msra.mxu1 %v4170_v5 }
 0xae0   :  { %3367 = vmatprep.subr.mxu1 %v4174_v6 }
 0xae1   :  { %3368 = vmatpush3.msra.mxu1 %v4174_v6 }
 0xae2   :  { %3369 = vmatprep.subr.mxu1 %v4178_v8 }
 0xae3   :  { %3370 = vmatpush3.msra.mxu1 %v4178_v8 }
 0xae4   :  { %3371 = vmatprep.subr.mxu1 %v4182_v11 }
 0xae5   :  { %3372 = vmatpush3.msra.mxu1 %v4182_v11  ;;  %v1530_v11 = vadd.f32 %v4502_v39, %v4461_v30 }
 0xae6   :  { %3373 = vmatprep.subr.mxu1 %v4186_v12 }
 0xae7   :  { %3374 = vmatpush3.msra.mxu1 %v4186_v12  ;;  %v1529_v12 = vadd.f32 %v4504_v18, %v4461_v30  ;;  %v2530_v22 = vsub.f32 %v3888_v7, %v1530_v11  ;;  %v2204_v18 = vld [vmem:[#allocation8 + $0x40] sm:$0xff] }
 0xae8   :  { %3376 = vmatmul.mubr.f32.vlgmr.msra.gmra.mxu1 %v1626_v47  ;;  %3378 = vmatprep.subr.mxu1 %v4258_v41  ;;  %v2203_v47 = vld [vmem:[#allocation8 + $0x38] sm:$0xff] }
 0xae9   :  { %3379 = vmatpush3.msra.mxu1 %v4258_v41  ;;  %v2529_v23 = vsub.f32 %v3890_v9, %v1529_v12  ;;  %v2532_v40 = vmul.f32 %v2530_v22, %v2530_v22  ;;  %v4776_v22 = vld [vmem:[#allocation18_spill] sm:$0xff] }
 0xaea   :  { %3380 = vmatprep.subr.mxu1 %v4263_v43 }
 0xaeb   :  { %3381 = vmatpush3.msra.mxu1 %v4263_v43 }
 0xaec   :  { %3382 = vmatprep.subr.mxu1 %v4270_v44 }
 0xaed   :  { %3383 = vmatpush3.msra.mxu1 %v4270_v44 }
 0xaee   :  { %3384 = vmatprep.subr.mxu1 %v4277_v45 }
 0xaef   :  { %3385 = vmatpush3.msra.mxu1 %v4277_v45 }
 0xaf0   :  { %3386 = vmatprep.subr.mxu1 %v4284_v46 }
 0xaf1   :  { %3387 = vmatpush3.msra.mxu1 %v4284_v46 }
 0xaf2   :  { %3388 = vmatprep.subr.mxu1 %v4291_v48 }
 0xaf3   :  { %3389 = vmatpush3.msra.mxu1 %v4291_v48 }
 0xaf4   :  { %3390 = vmatprep.subr.mxu1 %v4298_v51 }
 0xaf5   :  { %3391 = vmatpush3.msra.mxu1 %v4298_v51 }
 0xaf6   :  { %3392 = vmatprep.subr.mxu1 %v4305_v52 }
 0xaf7   :  { %3393 = vmatpush3.msra.mxu1 %v4305_v52 }
 0xaf8   :  { %3394 = vmatprep.subr.mxu1 %v4312_v53 }
 0xaf9   :  { %3395 = vmatpush3.msra.mxu1 %v4312_v53 }
 0xafa   :  { %3396 = vmatprep.subr.mxu1 %v4319_v54 }
 0xafb   :  { %3397 = vmatpush3.msra.mxu1 %v4319_v54 }
 0xafc   :  { %3398 = vmatprep.subr.mxu1 %v4326_v13 }
 0xafd   :  { %3399 = vmatpush3.msra.mxu1 %v4326_v13 }
 0xafe   :  { %3400 = vmatprep.subr.mxu1 %v4333_v14 }
 0xaff   :  { %3401 = vmatpush3.msra.mxu1 %v4333_v14 }
 0xb00   :  { %3402 = vmatprep.subr.mxu1 %v4340_v15 }
 0xb01   :  { %3403 = vmatpush3.msra.mxu1 %v4340_v15 }
 0xb02   :  { %3404 = vmatprep.subr.mxu1 %v4380_v26 }
 0xb03   :  { %3405 = vmatpush3.msra.mxu1 %v4380_v26 }
 0xb04   :  { %3406 = vmatprep.subr.mxu1 %v4388_v27 }
 0xb05   :  { %3407 = vmatpush3.msra.mxu1 %v4388_v27 }
 0xb06   :  { %3408 = vmatprep.subr.mxu1 %v4397_v28 }
 0xb07   :  { %3409 = vmatpush3.msra.mxu1 %v4397_v28 }
 0xb88   :  { %v4579_v49 = vpop.f32.mrf.mxu1 }
 0xb8a   :  { %v4581_v57 = vpop.f32.mrf.mxu1 }
 0xba8   :  { %v3377_v59 = vpop.f32.mrf.mxu1 }
 0xba9   :  { %1805 = vmatprep.subr.mxu0 %v3377_v59  ;;  %v2201_v59 = vld [vmem:[#allocation8 + $0x28] sm:$0xff] }
 0xbaa   :  { %v1768_v60 = vpop.f32.mrf.mxu1  ;;  %1806 = vmatpush1.msra.mxu0 %v3342_v58  ;;  %v2202_v58 = vld [vmem:[#allocation8 + $0x30] sm:$0xff] }
 0xbab   :  { %1807 = vmatprep.subr.mxu0 %v1768_v60  ;;  %v2200_v60 = vld [vmem:[#allocation8 + $0x20] sm:$0xff] }
 0xbac   :  { %1808 = vmatpush1.msra.mxu0 %v1693_v61 }
 0xbad   :  { %2741 = vmatmul.mubr.msk.f32.vlgmr.msra.gmra.mxu0 %vm178_vm0, %v4053_v42  ;;  %3413 = vmatprep.subr.mxu0 %v4258_v41 }
 0xbae   :  { %1847 = vmatprep.mubr.f32.mxu0 %v4775_v62  ;;  %3414 = vmatpush3.msra.mxu0 %v4258_v41  ;;  %v2531_v41 = vmul.f32 %v2529_v23, %v2529_v23 }
 0xbaf   :  { %3415 = vmatprep.subr.mxu0 %v4263_v43 }
 0xbb0   :  { %3416 = vmatpush3.msra.mxu0 %v4263_v43  ;;  %v2553_v43 = vsub.f32 %v4033_v34, %v4411_v31 }
 0xbb1   :  { %2742 = vmatmul.mubr.msk.f32.gmra.mxu0 %vm178_vm0, %v4075_v50  ;;  %3417 = vmatprep.subr.mxu0 %v4270_v44 }
 0xbb2   :  { %3418 = vmatpush3.msra.mxu0 %v4270_v44  ;;  %v2536_v44 = vsel %vm178_vm0, %v2532_v40, 0.0 }
 0xbb3   :  { %3419 = vmatprep.subr.mxu0 %v4277_v45 }
 0xbb4   :  { %3420 = vmatpush3.msra.mxu0 %v4277_v45  ;;  %v2554_v45 = vsub.f32 %v4036_v35, %v4416_v37  ;;  %v2209_v37 = vld [vmem:[#allocation8 + $0x68] sm:$0xff] }
 0xbb5   :  { %3421 = vmatprep.subr.mxu0 %v4284_v46 }
 0xbb6   :  { %3422 = vmatpush3.msra.mxu0 %v4284_v46  ;;  %v2533_v46 = vsel %vm178_vm0, %v2531_v41, 0.0  ;;  %v2556_v7 = vmul.f32 %v2554_v45, %v2554_v45 }
 0xbb7   :  { %3423 = vmatprep.subr.mxu0 %v4291_v48 }
 0xbb8   :  { %3424 = vmatpush3.msra.mxu0 %v4291_v48  ;;  %v2555_v48 = vmul.f32 %v2553_v43, %v2553_v43  ;;  %v2298_v43 = vld [vmem:[#allocation8 + $0xf8] sm:$0xff] }
 0xbb9   :  { %3425 = vmatprep.subr.mxu0 %v4298_v51 }
 0xbba   :  { %3426 = vmatpush3.msra.mxu0 %v4298_v51 }
 0xbbb   :  { %3427 = vmatprep.subr.mxu0 %v4305_v52 }
 0xbbc   :  { %3428 = vmatpush3.msra.mxu0 %v4305_v52 }
 0xbbd   :  { %3429 = vmatprep.subr.mxu0 %v4312_v53 }
 0xbbe   :  { %3430 = vmatpush3.msra.mxu0 %v4312_v53 }
 0xbbf   :  { %3431 = vmatprep.subr.mxu0 %v4319_v54 }
 0xbc0   :  { %3432 = vmatpush3.msra.mxu0 %v4319_v54  ;;  %v598_v54 = vadd.f32 %v4231_v17, %v4195_v16 }
 0xbc1   :  { %3433 = vmatprep.subr.mxu0 %v4326_v13 }
 0xbc2   :  { %3434 = vmatpush3.msra.mxu0 %v4326_v13 }
 0xbc3   :  { %3435 = vmatprep.subr.mxu0 %v4333_v14 }
 0xbc4   :  { %3436 = vmatpush3.msra.mxu0 %v4333_v14 }
 0xbc5   :  { %3437 = vmatprep.subr.mxu0 %v4340_v15 }
 0xbc6   :  { %3438 = vmatpush3.msra.mxu0 %v4340_v15 }
 0xbc7   :  { %3439 = vmatprep.subr.mxu0 %v4380_v26 }
 0xbc8   :  { %3440 = vmatpush3.msra.mxu0 %v4380_v26  ;;  %v599_v26 = vrot.slane %v598_v54, 4 }
 0xbc9   :  { %3441 = vmatprep.subr.mxu0 %v4388_v27 }
 0xbca   :  { %3442 = vmatpush3.msra.mxu0 %v4388_v27  ;;  %v3607_v27 = vld [vmem:[%s4772_s26 + $0x18] sm:$0xff] }
 0xbcb   :  { %3443 = vmatprep.subr.mxu0 %v4397_v28 }
 0xbcc   :  { %3444 = vmatpush3.msra.mxu0 %v4397_v28  ;;  %v600_v28 = vadd.f32 %v599_v26, %v598_v54  ;;  %v2294_v54 = vld [vmem:[#allocation8 + $0xd8] sm:$0xff]  ;;  %v2291_v26 = vld [vmem:[#allocation8 + $0xc0] sm:$0xff] }
 0xbcd   :  { %3455 = vmatprep.subr.mxu0 %v4471_v25 }
 0xbce   :  { %v601_v31 = vrot.slane %v600_v28, 2 }
 0xbd0   :  { %v602_v20 = vadd.f32 %v601_v31, %v600_v28  ;;  %v2288_v28 = vld [vmem:[#allocation8 + $0xa8] sm:$0xff] }
 0xc6d   :  { %v1843_v50 = vpop.f32.mrf.mxu0 }
 0xc6e   :  { %v1854_v63 = vadd.f32 %v4408_v29, %v1843_v50 }
 0xc6f   :  { %v1845_v0 = vpop.f32.mrf.mxu0 }
 0xc70   :  { %v1856_v1 = vadd.f32 %v4408_v29, %v1845_v0  ;;  %3410 = vmatprep.mubr.f32.mxu1 %v1854_v63  ;;  %v2602_v51 = vsub.f32 %v4120_v55, %v1854_v63  ;;  %v2199_v63 = vld [vmem:[#allocation8 + $0x18] sm:$0xff]  ;;  %v2198_v0 = vld [vmem:[#allocation8 + $0x10] sm:$0xff] }
 0xc71   :  { %v1849_v2 = vpop.f32.mrf.mxu0 }
 0xc72   :  { %v1855_v3 = vadd.f32 %v4408_v29, %v1849_v2  ;;  %3445 = vmatprep.mubr.f32.mxu0 %v1856_v1  ;;  %v2604_v52 = vmul.f32 %v2602_v51, %v2602_v51  ;;  %v2197_v1 = vld [vmem:[#allocation8 + $0x8] sm:$0xff]  ;;  %v2196_v2 = vld [vmem:[#allocation8] sm:$0xff] }
 0xc73   :  { %v1851_v5 = vpop.f32.mrf.mxu0 }
 0xc74   :  { %v1857_v6 = vadd.f32 %v4408_v29, %v1851_v5  ;;  %3411 = vmatmul.mubr.f32.vlgmr.msra.gmra.mxu1 %v1855_v3  ;;  %v2603_v9 = vsub.f32 %v4123_v56, %v1855_v3  ;;  %v2211_v56 = vld [vmem:[#allocation8 + $0x78] sm:$0xff]  ;;  %v2210_v29 = vld [vmem:[#allocation8 + $0x70] sm:$0xff]  ;;  %v1022_v5 = vadd.f32 %v4236_v19, %v4238_v21 }
 0xc75   :  { %3452 = vmatprep.mubr.msk.f32.mxu1 %vm178_vm0, %v4053_v42 }
 0xc76   :  { %3446 = vmatmul.mubr.f32.vlgmr.msra.gmra.mxu0 %v1857_v6  ;;  %v2605_v34 = vmul.f32 %v2603_v9, %v2603_v9  ;;  %v1023_v40 = vrot.slane %v1022_v5, 4  ;;  %v2296_v9 = vld [vmem:[#allocation8 + $0xe8] sm:$0xff] }
 0xc77   :  { %3456 = vmatpush3.msra.mxu0 %v4471_v25  ;;  %v603_v25 = vrot.slane %v602_v20, 1 }
 0xc78   :  { %3457 = vmatprep.subr.mxu0 %v4476_v32 }
 0xc79   :  { %3458 = vmatpush3.msra.mxu0 %v4476_v32  ;;  %v2207_v32 = vld [vmem:[#allocation8 + $0x58] sm:$0xff] }
 0xc7a   :  { %3459 = vmatprep.subr.mxu0 %v4487_v4 }
 0xc7b   :  { %3460 = vmatpush3.msra.mxu0 %v4487_v4  ;;  %v604_v4 = vadd.f32 %v603_v25, %v602_v20  ;;  %v2286_v20 = vld [vmem:[#allocation8 + $0x98] sm:$0xff]  ;;  %v2284_v25 = vld [vmem:[#allocation8 + $0x88] sm:$0xff] }
 0xc7c   :  { %3461 = vmatprep.subr.mxu0 %v4494_v10 }
 0xc7d   :  { %3462 = vmatpush3.msra.mxu0 %v4494_v10  ;;  %v2206_v10 = vld [vmem:[#allocation8 + $0x50] sm:$0xff]  ;;  %v2715_v33 = vmul.f32 -0.0625, %v604_v4  ;;  %v2283_v4 = vld [vmem:[#allocation8 + $0x80] sm:$0xff] }
 0xc7e   :  { %3501 = vmatprep.subr.mxu0 %v4775_v62 }
 0xc7f   :  { %v607_v39 = vmul.f32 1.442695, %v2715_v33 }
 0xc81   :  { %3561 = vpow2.f32 %v607_v39 }
 0xc8e   :  { %v3562_v61 = vpop.eup %3561 }
 0xc8f   :  { %v609_v50 = vadd.f32 1.0, %v3562_v61 }
 0xc91   :  { %3563 = vrcp.f32 %v609_v50 }
 0xc9e   :  { %v3564_v3 = vpop.eup %3563 }
 0xd34   :  { %v3412_v53 = vpop.f32.mrf.mxu1 }
 0xd36   :  { %v3447_v8 = vpop.f32.mrf.mxu0  ;;  %v1924_v14 = vpop.f32.mrf.mxu1 }
 0xd37   :  { %2012 = vrot.lane.b32.xlu1 %v3447_v8, %s3745_s29 }
 0xd38   :  { %v1999_v42 = vpop.f32.mrf.mxu0 }
 0xd39   :  { %2010 = vrot.lane.b32.xlu0 %v1999_v42, %s3745_s29 }
 0xd58   :  { %2537 = vadd.xlane.f32.xlu0 %v2536_v44  ;;  %v4777_v44 = vld [vmem:[#allocation19_spill] sm:$0xff] }
 0xd5b   :  { %2534 = vadd.xlane.f32.xlu1 %v2533_v46 }
 0xd5c   :  { %2557 = vadd.xlane.f32.xlu0 %v2555_v48 }
 0xd5f   :  { %2559 = vadd.xlane.f32.xlu1 %v2556_v7 }
 0xd60   :  { %2606 = vadd.xlane.f32.xlu0 %v2604_v52 }
 0xd63   :  { %2608 = vadd.xlane.f32.xlu1 %v2605_v34  ;;  %v2295_v34 = vld [vmem:[#allocation8 + $0xe0] sm:$0xff] }
 0xda9   :  { %v2013_v35 = vpop.permute.xlu1 %2012 }
 0xdaa   :  { %v2017_v13 = vsel %vm178_vm0, %v3412_v53, %v2013_v35 }
 0xdab   :  { %3448 = vmatprep.subr.mxu1 %v2017_v13  ;;  %v2011_v55 = vpop.permute.xlu0 %2010 }
 0xdac   :  { %3449 = vmatpush3.msra.mxu1 %v2017_v13  ;;  %v2016_v15 = vsel %vm178_vm0, %v1924_v14, %v2011_v55  ;;  %v2293_v13 = vld [vmem:[#allocation8 + $0xd0] sm:$0xff]  ;;  %v2292_v55 = vld [vmem:[#allocation8 + $0xc8] sm:$0xff] }
 0xdad   :  { %3450 = vmatprep.subr.mxu1 %v2016_v15 }
 0xdae   :  { %3451 = vmatpush3.msra.mxu1 %v2016_v15 }
 0xdaf   :  { %3453 = vmatmul.mubr.msk.f32.vlgmr.msra.gmra.mxu1 %vm178_vm0, %v3607_v27  ;;  %3466 = vmatprep.subr.mxu1 %v4775_v62  ;;  %v2289_v27 = vld [vmem:[#allocation8 + $0xb0] sm:$0xff] }
 0xdb0   :  { %3467 = vmatpush3.xpose.msra.mxu1 %v2211_v56  ;;  %3498 = vmatprep.mubr.msk.f32.mxu1 %vm3746_vm4, %v4775_v62  ;;  %v2290_v56 = vld [vmem:[#allocation8 + $0xb8] sm:$0xff] }
 0xdb1   :  { %3468 = vmatprep.subr.mxu1 %v4775_v62 }
 0xdb4   :  { %3469 = vmatpush3.xpose.msra.mxu1 %v2210_v29  ;;  %v2287_v29 = vld [vmem:[#allocation8 + $0xa0] sm:$0xff] }
 0xdb5   :  { %3470 = vmatprep.subr.mxu1 %v4775_v62 }
 0xdb8   :  { %3471 = vmatpush3.xpose.msra.mxu1 %v2209_v37 }
 0xdb9   :  { %3472 = vmatprep.subr.mxu1 %v4775_v62 }
 0xdbc   :  { %3473 = vmatpush3.xpose.msra.mxu1 %v2208_v24  ;;  %v2285_v24 = vld [vmem:[#allocation8 + $0x90] sm:$0xff] }
 0xdbd   :  { %3474 = vmatprep.subr.mxu1 %v4775_v62 }
 0xdc0   :  { %3475 = vmatpush3.xpose.msra.mxu1 %v2207_v32 }
 0xdc1   :  { %3476 = vmatprep.subr.mxu1 %v4775_v62 }
 0xdc4   :  { %3477 = vmatpush3.xpose.msra.mxu1 %v2206_v10 }
 0xdc5   :  { %3478 = vmatprep.subr.mxu1 %v4775_v62 }
 0xdc8   :  { %3479 = vmatpush3.xpose.msra.mxu1 %v2205_v36  ;;  %v2738_v36 = vld [vmem:[%s4754_s13] ss:$0 sm:$0xff] }
 0xdc9   :  { %3480 = vmatprep.subr.mxu1 %v4775_v62 }
 0xdcc   :  { %3481 = vmatpush3.xpose.msra.mxu1 %v2204_v18  ;;  %v1622_v18 = vadd.f32 %v4579_v49, %v2738_v36 }
 0xdcd   :  { %3482 = vmatprep.subr.mxu1 %v4775_v62 }
 0xdd0   :  { %3483 = vmatpush3.xpose.msra.mxu1 %v2203_v47 }
 0xdd1   :  { %3484 = vmatprep.subr.mxu1 %v4775_v62 }
 0xdd4   :  { %3485 = vmatpush3.xpose.msra.mxu1 %v2202_v58 }
 0xdd5   :  { %3486 = vmatprep.subr.mxu1 %v4775_v62 }
 0xdd8   :  { %3487 = vmatpush3.xpose.msra.mxu1 %v2201_v59  ;;  %v1617_v59 = vadd.f32 %v2738_v36, %v4581_v57 }
 0xdd9   :  { %3488 = vmatprep.subr.mxu1 %v4775_v62 }
 0xddc   :  { %3489 = vmatpush3.xpose.msra.mxu1 %v2200_v60 }
 0xddd   :  { %3490 = vmatprep.subr.mxu1 %v4775_v62 }
 0xde0   :  { %3491 = vmatpush3.xpose.msra.mxu1 %v2199_v63 }
 0xde1   :  { %3492 = vmatprep.subr.mxu1 %v4775_v62 }
 0xde4   :  { %3493 = vmatpush3.xpose.msra.mxu1 %v2198_v0 }
 0xde5   :  { %3494 = vmatprep.subr.mxu1 %v4775_v62 }
 0xde8   :  { %3495 = vmatpush3.xpose.msra.mxu1 %v2197_v1 }
 0xde9   :  { %3496 = vmatprep.subr.mxu1 %v4775_v62 }
 0xdec   :  { %3497 = vmatpush3.xpose.msra.mxu1 %v2196_v2 }
 0xdef   :  { %3499 = vmatmul.mubr.f32.vlgmr.msra.gmra.mxu1 %v3564_v3 }
 0xdf0   :  { %3538 = vmatprep.mubr.f32.mxu1 %v4195_v16 }
 0xe6f   :  { %v3454_v6 = vpop.f32.mrf.mxu1 }
 0xe70   :  { %v2094_v8 = vadd.f32 %v3454_v6, %v4461_v30  ;;  %v2096_v41 = vadd.f32 %v3454_v6, %v4500_v38 }
 0xe71   :  { %v2084_v42 = vpop.f32.mrf.mxu1 }
 0xe72   :  { %v2093_v11 = vadd.f32 %v2084_v42, %v4461_v30  ;;  %v2095_v12 = vadd.f32 %v2084_v42, %v4500_v38  ;;  %v2579_v23 = vsub.f32 %v4776_v22, %v2094_v8  ;;  %v1024_v30 = vadd.f32 %v1023_v40, %v1022_v5  ;;  %v2297_v38 = vld [vmem:[#allocation8 + $0xf0] sm:$0xff] }
 0xe74   :  { %3463 = vmatprep.mubr.msk.f32.mxu0 %vm1543_vm3, %v2095_v12  ;;  %v2581_v16 = vmul.f32 %v2579_v23, %v2579_v23  ;;  %v2578_v45 = vsub.f32 %v4777_v44, %v2093_v11  ;;  %v1025_v7 = vrot.slane %v1024_v30, 2  ;;  %v2538_v44 = vpop.xlane.xlu0 %2537 }
 0xe75   :  { %3464 = vmatmul.mubr.msk.f32.vlgmr.msra.gmra.mxu0 %vm1543_vm3, %v2096_v41 }
 0xe76   :  { %3502 = vmatpush3.xpose.msra.mxu0 %v2298_v43  ;;  %v2585_v46 = vsel %vm178_vm0, %v2581_v16, 0.0  ;;  %v2580_v48 = vmul.f32 %v2578_v45, %v2578_v45  ;;  %3533 = vmatprep.mubr.msk.f32.mxu0 %vm3746_vm4, %v4775_v62  ;;  %v1026_v52 = vadd.f32 %v1025_v7, %v1024_v30  ;;  %v2535_v45 = vpop.xlane.xlu1 %2534 }
 0xe77   :  { %2586 = vadd.xlane.f32.xlu1 %v2585_v46  ;;  %3503 = vmatprep.subr.mxu0 %v4775_v62 }
 0xe78   :  { %v2582_v51 = vsel %vm178_vm0, %v2580_v48, 0.0  ;;  %v1027_v53 = vrot.slane %v1026_v52, 1  ;;  %v2558_v46 = vpop.xlane.xlu0 %2557 }
 0xe79   :  { %2583 = vadd.xlane.f32.xlu0 %v2582_v51 }
 0xe7a   :  { %3504 = vmatpush3.xpose.msra.mxu0 %v2297_v38  ;;  %v1028_v35 = vadd.f32 %v1027_v53, %v1026_v52  ;;  %v2560_v48 = vpop.xlane.xlu1 %2559  ;;  %v2539_v53 = vadd.f32 %v2538_v44, %v2535_v45 }
 0xe7b   :  { %3505 = vmatprep.subr.mxu0 %v4775_v62  ;;  %v2561_v52 = vadd.f32 %v2560_v48, %v2558_v46 }
 0xe7c   :  { %v2730_v14 = vmul.f32 -0.0625, %v1028_v35  ;;  %v2607_v30 = vpop.xlane.xlu0 %2606 }
 0xe7d   :  { %v2562_v35 = vrot.slane %v2561_v52, 4 }
 0xe7e   :  { %3506 = vmatpush3.xpose.msra.mxu0 %v2296_v9  ;;  %v1031_v15 = vmul.f32 1.442695, %v2730_v14  ;;  %v2609_v38 = vpop.xlane.xlu1 %2608 }
 0xe7f   :  { %3507 = vmatprep.subr.mxu0 %v4775_v62 }
 0xe80   :  { %3565 = vpow2.f32 %v1031_v15 }
 0xe82   :  { %3508 = vmatpush3.xpose.msra.mxu0 %v2295_v34  ;;  %v2610_v34 = vadd.f32 %v2609_v38, %v2607_v30  ;;  %v4778_v38 = vlaneseq }
 0xe83   :  { %3509 = vmatprep.subr.mxu0 %v4775_v62 }
 0xe86   :  { %3510 = vmatpush3.xpose.msra.mxu0 %v2294_v54 }
 0xe87   :  { %3511 = vmatprep.subr.mxu0 %v4775_v62 }
 0xe8a   :  { %3512 = vmatpush3.xpose.msra.mxu0 %v2293_v13  ;;  %v2611_v13 = vrot.slane %v2610_v34, 4 }
 0xe8b   :  { %3513 = vmatprep.subr.mxu0 %v4775_v62 }
 0xe8d   :  { %v3566_v31 = vpop.eup %3565 }
 0xe8e   :  { %3514 = vmatpush3.xpose.msra.mxu0 %v2292_v55  ;;  %v1033_v37 = vadd.f32 1.0, %v3566_v31  ;;  %v2612_v55 = vadd.f32 %v2611_v13, %v2610_v34 }
 0xe8f   :  { %3515 = vmatprep.subr.mxu0 %v4775_v62 }
 0xe90   :  { %3567 = vrcp.f32 %v1033_v37 }
 0xe92   :  { %3516 = vmatpush3.xpose.msra.mxu0 %v2291_v26 }
 0xe93   :  { %3517 = vmatprep.subr.mxu0 %v4775_v62 }
 0xe96   :  { %3518 = vmatpush3.xpose.msra.mxu0 %v2290_v56  ;;  %v2613_v56 = vrot.slane %v2612_v55, 2 }
 0xe97   :  { %3519 = vmatprep.subr.mxu0 %v4775_v62 }
 0xe98   :  { %v2614_v31 = vadd.f32 %v2613_v56, %v2612_v55 }
 0xe9a   :  { %3520 = vmatpush3.xpose.msra.mxu0 %v2289_v27 }
 0xe9b   :  { %3521 = vmatprep.subr.mxu0 %v4775_v62 }
 0xe9d   :  { %v3568_v33 = vpop.eup %3567 }
 0xe9e   :  { %3522 = vmatpush3.xpose.msra.mxu0 %v2288_v28 }
 0xe9f   :  { %3523 = vmatprep.subr.mxu0 %v4775_v62 }
 0xea2   :  { %3524 = vmatpush3.xpose.msra.mxu0 %v2287_v29 }
 0xea3   :  { %3525 = vmatprep.subr.mxu0 %v4775_v62 }
 0xea6   :  { %3526 = vmatpush3.xpose.msra.mxu0 %v2286_v20 }
 0xea7   :  { %3527 = vmatprep.subr.mxu0 %v4775_v62 }
 0xeaa   :  { %3528 = vmatpush3.xpose.msra.mxu0 %v2285_v24 }
 0xeab   :  { %3529 = vmatprep.subr.mxu0 %v4775_v62 }
 0xeae   :  { %3530 = vmatpush3.xpose.msra.mxu0 %v2284_v25  ;;  %v2615_v25 = vrot.slane %v2614_v31, 1 }
 0xeaf   :  { %v2278_v32 = vpop.f32.mrf.mxu1  ;;  %3531 = vmatprep.subr.mxu0 %v4775_v62 }
 0xeb1   :  { %v3500_v10 = vpop.f32.mrf.mxu1 }
 0xeb2   :  { %3532 = vmatpush3.xpose.msra.mxu0 %v2283_v4 }
 0xeb5   :  { %3534 = vmatmul.mubr.f32.vlgmr.msra.gmra.mxu0 %v3568_v33  ;;  %v2616_v33 = vadd.f32 %v2615_v25, %v2614_v31 }
 0xeb7   :  { %vm2619_vm8 = vcmp.eq.f32.partialorder %v2616_v33, inf  ;;  %vm2621_vm12 = vcmp.eq.f32.partialorder %v2616_v33, 0.0 }
 0xf00   :  { %v2587_v7 = vpop.xlane.xlu1 %2586 }
 0xf02   :  { %v2584_v51 = vpop.xlane.xlu0 %2583 }
 0xf03   :  { %v2588_v9 = vadd.f32 %v2587_v7, %v2584_v51  ;;  %v2654_v51 = vand.u32 127, %v4778_v38 }
 0xf05   :  { %v2589_v54 = vrot.slane %v2588_v9, 4  ;;  %vm2657_vm1 = vcmp.eq.s32.totalorder %v2654_v51, 1 }
 0xf07   :  { %v2590_v14 = vadd.f32 %v2589_v54, %v2588_v9 }
 0xf09   :  { %v2591_v15 = vrot.slane %v2590_v14, 2 }
 0xf0b   :  { %v2592_v28 = vadd.f32 %v2591_v15, %v2590_v14 }
 0xf0d   :  { %v2593_v20 = vrot.slane %v2592_v28, 1 }
 0xf0f   :  { %v2594_v4 = vadd.f32 %v2593_v20, %v2592_v28 }
 0xf11   :  { %vm2597_vm6 = vcmp.eq.f32.partialorder %v2594_v4, inf  ;;  %vm2599_vm9 = vcmp.eq.f32.partialorder %v2594_v4, 0.0 }
 0xf35   :  { %v3465_v39 = vpop.f32.mrf.mxu0 }
 0xf36   :  { %v2175_v47 = vadd.f32 %v3465_v39, %v2738_v36 }
 0xf37   :  { %v2169_v58 = vpop.f32.mrf.mxu0 }
 0xf38   :  { %v2179_v60 = vadd.f32 %v2175_v47, %v1622_v18  ;;  %v2628_v61 = vsub.f32 %v1622_v18, %v2175_v47  ;;  %v2170_v50 = vadd.f32 %v2738_v36, %v2169_v58 }
 0xf3a   :  { %v2748_v62 = vmul.f32 -0.5, %v2179_v60  ;;  %v2178_v63 = vadd.f32 %v2170_v50, %v1617_v59  ;;  %v2627_v0 = vsub.f32 %v1617_v59, %v2170_v50  ;;  %v2630_v1 = vmul.f32 %v2628_v61, %v2628_v61 }
 0xf3c   :  { %v2186_v2 = vmul.f32 1.442695, %v2748_v62  ;;  %v2747_v3 = vmul.f32 -0.5, %v2178_v63  ;;  %v2634_v5 = vsel %vm178_vm0, %v2630_v1, 0.0  ;;  %v2629_v6 = vmul.f32 %v2627_v0, %v2627_v0 }
 0xf3d   :  { %2635 = vadd.xlane.f32.xlu1 %v2634_v5 }
 0xf3e   :  { %3569 = vpow2.f32 %v2186_v2  ;;  %v2184_v8 = vmul.f32 1.442695, %v2747_v3  ;;  %v2631_v49 = vsel %vm178_vm0, %v2629_v6, 0.0 }
 0xf3f   :  { %2632 = vadd.xlane.f32.xlu0 %v2631_v49 }
 0xf40   :  { %3571 = vpow2.f32 %v2184_v8 }
 0xf4b   :  { %v3570_v57 = vpop.eup %3569 }
 0xf4c   :  { %v2189_v42 = vadd.f32 1.0, %v3570_v57  ;;  %v2600_v57 = vand.u32 2147483648, %v2594_v4 }
 0xf4d   :  { %v3572_v11 = vpop.eup %3571 }
 0xf4e   :  { %3573 = vrcp.f32 %v2189_v42  ;;  %v2188_v12 = vadd.f32 1.0, %v3572_v11 }
 0xf50   :  { %3575 = vrcp.f32 %v2188_v12 }
 0xf51   :  { %3577 = vrsqrt.f32 %v2594_v4 }
 0xf5b   :  { %v3574_v22 = vpop.eup %3573 }
 0xf5c   :  { %2195 = vst.msk [vmem:[#allocation10 + $0x8] sm:$0xff] %vm178_vm0, %v3574_v22  ;;  %v2622_v22 = vand.u32 2147483648, %v2616_v33 }
 0xf5d   :  { %v3576_v23 = vpop.eup %3575 }
 0xf5e   :  { %2194 = vst.msk [vmem:[#allocation10] sm:$0xff] %vm178_vm0, %v3576_v23  ;;  %v3578_v50 = vpop.eup %3577  ;;  %vm2655_vm0 = vcmp.eq.s32.totalorder %v2654_v51, 0 }
 0xf5f   :  { %v2596_v1 = vmul.f32 %v3578_v50, %v2594_v4 }
 0xf61   :  { %v2598_v49 = vsel %vm2597_vm6, %v2594_v4, %v2596_v1 }
 0xf62   :  { %v2601_v23 = vsel %vm2599_vm9, %v2600_v57, %v2598_v49 }
 0xf75   :  { %v2365_v40 = vpop.f32.mrf.mxu0 }
 0xf76   :  { %v2370_v41 = vrot.slane %v2365_v40, 7 }
 0xf77   :  { %v3535_v43 = vpop.f32.mrf.mxu0 }
 0xf78   :  { %v2373_v16 = vsel %vm2372_vm5, %v2278_v32, %v2370_v41 }
 0xf79   :  { %3536 = vmatprep.subr.mxu1 %v2373_v16 }
 0xf7a   :  { %3537 = vmatpush3.xpose.msra.mxu1 %v2373_v16 }
 0xf7d   :  { %3539 = vmatmul.mubr.f32.vlgmr.msra.gmra.mxu1 %v4231_v17  ;;  %v2540_v17 = vrot.slane %v2539_v53, 4 }
 0xf7e   :  { %3541 = vmatprep.mubr.f32.mxu1 %v4238_v21  ;;  %v2563_v21 = vadd.f32 %v2562_v35, %v2561_v52 }
 0xf80   :  { %v2564_v26 = vrot.slane %v2563_v21, 2 }
 0xf81   :  { %3542 = vmatmul.mubr.f32.gmra.mxu1 %v4236_v19  ;;  %v2541_v19 = vadd.f32 %v2540_v17, %v2539_v53 }
 0xf82   :  { %v2565_v29 = vadd.f32 %v2564_v26, %v2563_v21 }
 0xf83   :  { %v2542_v27 = vrot.slane %v2541_v19, 2 }
 0xf84   :  { %v2566_v24 = vrot.slane %v2565_v29, 1 }
 0xf85   :  { %v2543_v37 = vadd.f32 %v2542_v27, %v2541_v19 }
 0xf86   :  { %v2567_v10 = vadd.f32 %v2566_v24, %v2565_v29 }
 0xf87   :  { %v2544_v32 = vrot.slane %v2543_v37, 1 }
 0xf88   :  { %3579 = vrsqrt.f32 %v2567_v10  ;;  %vm2570_vm7 = vcmp.eq.f32.partialorder %v2567_v10, inf  ;;  %v2573_v12 = vand.u32 2147483648, %v2567_v10  ;;  %vm2572_vm11 = vcmp.eq.f32.partialorder %v2567_v10, 0.0 }
 0xf89   :  { %v2545_v36 = vadd.f32 %v2544_v32, %v2543_v37  ;;  %3581 = vrsqrt.f32 %v2616_v33 }
 0xf8b   :  { %3583 = vrsqrt.f32 %v2545_v36  ;;  %vm2548_vm10 = vcmp.eq.f32.partialorder %v2545_v36, inf  ;;  %v2551_v41 = vand.u32 2147483648, %v2545_v36  ;;  %vm2550_vm13 = vcmp.eq.f32.partialorder %v2545_v36, 0.0 }
 0xf95   :  { %v3580_v62 = vpop.eup %3579 }
 0xf96   :  { %v3582_v0 = vpop.eup %3581  ;;  %v2569_v5 = vmul.f32 %v3580_v62, %v2567_v10 }
 0xf97   :  { %v2618_v6 = vmul.f32 %v3582_v0, %v2616_v33 }
 0xf98   :  { %v3584_v3 = vpop.eup %3583  ;;  %v2571_v42 = vsel %vm2570_vm7, %v2567_v10, %v2569_v5 }
 0xf99   :  { %v2547_v8 = vmul.f32 %v3584_v3, %v2545_v36  ;;  %v2620_v11 = vsel %vm2619_vm8, %v2616_v33, %v2618_v6  ;;  %v2574_v43 = vsel %vm2572_vm11, %v2573_v12, %v2571_v42 }
 0xf9a   :  { %v2623_v16 = vsel %vm2621_vm12, %v2622_v22, %v2620_v11 }
 0xf9b   :  { %v2549_v40 = vsel %vm2548_vm10, %v2545_v36, %v2547_v8  ;;  %v2624_v44 = vadd.f32 %v2623_v16, %v2601_v23 }
 0xf9c   :  { %v2552_v45 = vsel %vm2550_vm13, %v2551_v41, %v2549_v40 }
 0xf9d   :  { %v2575_v46 = vadd.f32 %v2574_v43, %v2552_v45  ;;  %v2625_v48 = vmul.f32 0.5, %v2624_v44 }
 0xf9f   :  { %v2576_v7 = vmul.f32 0.5, %v2575_v46 }
 0xfa1   :  { %v2626_v34 = vadd.f32 %v2625_v48, %v2576_v7 }
 0xfa3   :  { %v2656_v13 = vsel %vm2655_vm0, %v2626_v34, 0.0 }
 0xfc6   :  { %v2636_v39 = vpop.xlane.xlu1 %2635 }
 0xfc8   :  { %v2633_v18 = vpop.xlane.xlu0 %2632 }
 0xfc9   :  { %v2637_v47 = vadd.f32 %v2636_v39, %v2633_v18 }
 0xfcb   :  { %v2638_v58 = vrot.slane %v2637_v47, 4 }
 0xfcd   :  { %v2639_v59 = vadd.f32 %v2638_v58, %v2637_v47 }
 0xfcf   :  { %v2640_v60 = vrot.slane %v2639_v59, 2 }
 0xfd1   :  { %v2641_v61 = vadd.f32 %v2640_v60, %v2639_v59 }
 0xfd3   :  { %v2642_v63 = vrot.slane %v2641_v61, 1 }
 0xfd5   :  { %v2643_v2 = vadd.f32 %v2642_v63, %v2641_v61 }
 0xfd7   :  { %3585 = vrsqrt.f32 %v2643_v2  ;;  %vm2646_vm14 = vcmp.eq.f32.partialorder %v2643_v2, inf  ;;  %v2649_v52 = vand.u32 2147483648, %v2643_v2  ;;  %vm2648_vm15 = vcmp.eq.f32.partialorder %v2643_v2, 0.0 }
 0xfe4   :  { %v3586_v30 = vpop.eup %3585 }
 0xfe5   :  { %v2645_v9 = vmul.f32 %v3586_v30, %v2643_v2 }
 0xfe7   :  { %v2647_v53 = vsel %vm2646_vm14, %v2643_v2, %v2645_v9 }
 0xfe8   :  { %v2650_v54 = vsel %vm2648_vm15, %v2649_v52, %v2647_v53 }
 0xfe9   :  { %v2651_v35 = vmul.f32 2.0, %v2650_v54 }
 0xfeb   :  { %v2658_v17 = vsel %vm2657_vm1, %v2651_v35, 0.0 }
 0xfec   :  { %v2659_v14 = vadd.f32 %v2658_v17, %v2656_v13 }
 0xfee   :  { %2660 = vst [vmem:[%s4759_s18] sm:$0x1] %v2659_v14  ;;  %s3747_s18 = smov [#allocation10]  }
 0xfef   :  { %s2666_s6 = sshll.u32 %s3747_s18, 4  ;;  %s2667_s6 = int_to_ptr.vmem [resolvable:$true] %s2666_s6 }
 0xff0   :  { %s3688_s24 = scalar_lea.vmem %s2667_s6, 256  ;;  %p3693_p7 = scmp.lt.s32.totalorder %s2667_s6, %s2667_s6 }
 0xff1   :  { %p3689_p6 = scmp.ne.s32.totalorder %s2667_s6, %s3688_s24  ;;  %p3694_p8 = scmp.lt.s32.totalorder %s3688_s24, %s3688_s24 }
 0xff3   :  { %p3695_p9 = por %p3694_p8, %p3693_p7 }
 0xff5   :  { %p3696_p10 = pnand %p3695_p9, %p3689_p6 }
0x103d   :  { %v3540_v21 = vpop.f32.mrf.mxu1 }
0x103e   :  { %v2750_v55 = vmul.f32 -1.442695, %v3540_v21 }
0x103f   :  { %v2440_v19 = vpop.f32.mrf.mxu1 }
0x1040   :  { %3587 = vpow2.f32 %v2750_v55  ;;  %v2749_v15 = vmul.f32 -1.442695, %v2440_v19 }
0x1041   :  { %v3543_v26 = vpop.f32.mrf.mxu1 }
0x1042   :  { %3589 = vpow2.f32 %v2749_v15  ;;  %v2752_v56 = vmul.f32 -1.442695, %v3543_v26 }
0x1043   :  { %v2450_v27 = vpop.f32.mrf.mxu1 }
0x1044   :  { %3591 = vpow2.f32 %v2752_v56  ;;  %v2751_v28 = vmul.f32 -1.442695, %v2450_v27 }
0x1046   :  { %3593 = vpow2.f32 %v2751_v28 }
0x104d   :  { %v3588_v29 = vpop.eup %3587 }
0x104e   :  { %v2472_v37 = vadd.f32 1.0, %v3588_v29 }
0x104f   :  { %v3590_v31 = vpop.eup %3589 }
0x1050   :  { %v2471_v24 = vadd.f32 1.0, %v3590_v31  ;;  %3595 = vrcp.f32 %v2472_v37 }
0x1051   :  { %v3592_v20 = vpop.eup %3591 }
0x1052   :  { %v2474_v25 = vadd.f32 1.0, %v3592_v20 }
0x1053   :  { %v3594_v32 = vpop.eup %3593 }
0x1054   :  { %3597 = vrcp.f32 %v2474_v25  ;;  %v2473_v4 = vadd.f32 1.0, %v3594_v32 }
0x1055   :  { %3599 = vrcp.f32 %v2471_v24 }
0x1056   :  { %3601 = vrcp.f32 %v2473_v4 }
0x105d   :  { %v3596_v10 = vpop.eup %3595 }
0x1061   :  { %v3598_v33 = vpop.eup %3597 }
0x1062   :  { %v3600_v36 = vpop.eup %3599  ;;  %v2484_v39 = vadd.f32 %v3598_v33, %v3596_v10 }
0x1063   :  { %v3602_v18 = vpop.eup %3601 }
0x1064   :  { %v2483_v47 = vadd.f32 %v3602_v18, %v3600_v36  ;;  %3603 = vrcp.f32 %v2484_v39 }
0x1066   :  { %3605 = vrcp.f32 %v2483_v47 }
0x1071   :  { %v3604_v58 = vpop.eup %3603 }
0x1072   :  { %v2492_v59 = vmul.f32 %v3604_v58, %v3598_v33  ;;  %v2490_v60 = vmul.f32 %v3604_v58, %v3596_v10 }
0x1073   :  { %3699 = shalt.err (!%p3696_p10)
}
0x1074   :  { %2672 = dma.vmem_to_hbm [thread:$0]  %s2667_s6, 256, %s4756_s15, [#allocation4], %s3740_s19, %s3740_s19, %s3741_s1   ;;  %v3606_v61 = vpop.eup %3605 }
0x1075   :  { %s3708_s2 = scalar_lea.vmem %s2679_s23, 256  ;;  %p3713_p12 = scmp.lt.s32.totalorder %s2679_s23, %s2679_s23 }
0x1076   :  { %p3709_p11 = scmp.ne.s32.totalorder %s2679_s23, %s3708_s2  ;;  %p3714_p13 = scmp.lt.s32.totalorder %s3708_s2, %s3708_s2 }
0x1078   :  { %p3715_p0 = por %p3714_p13, %p3713_p12 }
0x107a   :  { %p3716_p1 = pnand %p3715_p0, %p3709_p11 }
0x107c   :  { %3719 = shalt.err (!%p3716_p1)
}
0x107d   :  { %2684 = dma.vmem_to_hbm [thread:$0]  %s2679_s23, 256, %s4757_s16, [#allocation12], %s3740_s19, %s3740_s19, %s3741_s1   ;;  %v2491_v50 = vmul.f32 %v3606_v61, %v3602_v18  ;;  %v2489_v62 = vmul.f32 %v3606_v61, %v3600_v36  ;;  %vm2515_vm2 = vcmask 7168   ;;  %vm2518_vm3 = vcmask 15360  }
0x107e   :  { %s3749_s10 = smov 1   ;;  %s3750_s15 = smov 2   ;;  %vm2521_vm4 = vcmask 23552   ;;  %vm2524_vm5 = vcmask 31744  }
0x107f   :  { %2497 = vrot.lane.b32.xlu1 %v2492_v59, %s3749_s10  ;;  %2505 = vrot.lane.b32.xlu0 %v2490_v60, %s3749_s10 }
0x1083   :  { %2495 = vrot.lane.b32.xlu0 %v2491_v50, %s3749_s10  ;;  %2503 = vrot.lane.b32.xlu1 %v2489_v62, %s3749_s10 }
0x1087   :  { %2511 = vrot.lane.b32.xlu0 %v2492_v59, %s3750_s15  ;;  %2509 = vrot.lane.b32.xlu1 %v2491_v50, %s3750_s15 }
0x10f1   :  { %v2498_v63 = vpop.permute.xlu1 %2497  ;;  %v2506_v0 = vpop.permute.xlu0 %2505 }
0x10f2   :  { %v2517_v3 = vsel %vm2515_vm2, %v2490_v60, %v2498_v63 }
0x10f3   :  { %v2520_v6 = vsel %vm2518_vm3, %v2517_v3, %v2506_v0 }
0x10f5   :  { %v2496_v1 = vpop.permute.xlu0 %2495  ;;  %v2504_v2 = vpop.permute.xlu1 %2503 }
0x10f6   :  { %v2516_v5 = vsel %vm2515_vm2, %v2489_v62, %v2496_v1 }
0x10f7   :  { %v2519_v8 = vsel %vm2518_vm3, %v2516_v5, %v2504_v2 }
0x10f9   :  { %v2512_v49 = vpop.permute.xlu0 %2511  ;;  %v2510_v57 = vpop.permute.xlu1 %2509 }
0x10fa   :  { %v2523_v42 = vsel %vm2521_vm4, %v2520_v6, %v2512_v49  ;;  %v2522_v11 = vsel %vm2521_vm4, %v2519_v8, %v2510_v57 }
0x10fb   :  { %v2526_v12 = vsel %vm2524_vm5, %v2523_v42, 0.0  ;;  %v2525_v22 = vsel %vm2524_vm5, %v2522_v11, 0.0 }
0x10fc   :  { %2528 = vst [vmem:[%s4758_s17 + $0x8] sm:$0xff] %v2526_v12  ;;  %2527 = vst [vmem:[%s4758_s17] sm:$0xff] %v2525_v22 }
0x10fd   :  { %3734 = dma.done.wait [#allocation4], 256  }
0x10fe   :  { %3735 = vsyncadd [#allocation4], 4294967040 }
0x10ff   :  { %3736 = dma.done.wait [#allocation12], 256  }
0x1100   :  { %3737 = vsyncadd [#allocation12], 4294967040 }
0x1101   :  { %2699 = vsyncpa [#allocation3], 1 }
0x1102   :  { %2700 = vsyncpa [#allocation6], 1 }
0x1103   :  { %2701 = vsyncpa [#allocation9], 1 }
0x1104   :  { %2702 = vsyncpa [#allocation4], 1 }
0x1105   :  { %2703 = vsyncpa [#allocation12], 1 }

</bundles_post_ra>
